<compile_context>
chip_gen: v6e
topology: v6e:2x2x1
jax: 0.10.0
libtpu: 0.0.40
codegen_flags: <defaults>
</compile_context>

<pallas_src>
import functools

import jax
import jax.numpy as jnp
from jax import lax
from jax.experimental import pallas as pl
from jax.experimental.pallas import tpu as pltpu


def _round_up(x, m):
    return ((x + m - 1) // m) * m


def _vmem_capacity_bytes():
    """Physical VMEM per TensorCore (generation-aware, conservative fallback)."""
    try:
        return int(pltpu.get_tpu_info().vmem_capacity_bytes)
    except Exception:
        return 64 * 1024 * 1024  # v7x-sized fallback: safe on every generation


# ---------------------------------------------------------------------------
# Node-feature linear:  y = x @ W + b
# ---------------------------------------------------------------------------
def linear_kernel(x_ref, w_ref, b_ref, o_ref):
    o_ref[...] = (
        jnp.dot(x_ref[...], w_ref[...], preferred_element_type=jnp.float32)
        + b_ref[...]
    )


def pallas_linear(x2d, w, b, *, max_rows_per_block=2048):
    N, F = x2d.shape
    H = w.shape[1]
    rpb = min(_round_up(N, 8), max_rows_per_block)
    Np = _round_up(N, rpb)
    xp = jnp.pad(x2d, ((0, Np - N), (0, 0))) if Np != N else x2d
    y = pl.pallas_call(
        linear_kernel,
        out_shape=jax.ShapeDtypeStruct((Np, H), jnp.float32),
        grid_spec=pltpu.PrefetchScalarGridSpec(
            num_scalar_prefetch=0,
            grid=(Np // rpb,),
            in_specs=[
                pl.BlockSpec((rpb, F), lambda i: (i, 0)),
                pl.BlockSpec((F, H), lambda i: (0, 0)),
                pl.BlockSpec((1, H), lambda i: (0, 0)),
            ],
            out_specs=pl.BlockSpec((rpb, H), lambda i: (i, 0)),
        ),
        compiler_params=pltpu.CompilerParams(
            dimension_semantics=("parallel",),
        ),
    )(xp, w, b.reshape(1, H))
    return y if Np == N else y[:N]


# ---------------------------------------------------------------------------
# Fused edge kernel: projection + layout change + masked CLS row/mean
# ---------------------------------------------------------------------------
def _edge_tiling(L, Fe, H):
    """Pick i-rows per block from the VMEM budget; return (tile_i, vmem_limit)."""
    cap = _vmem_capacity_bytes()
    bytes_per_i = _round_up(L, 8) * _round_up(Fe, 128) * 4   # one i-row of the input block
    x_budget = int(cap * 0.20)                               # single input buffer budget
    tile_i = (x_budget // max(bytes_per_i, 1)) // 8 * 8
    tile_i = max(8, min(_round_up(L, 8), tile_i))
    est = (2 * tile_i * bytes_per_i                                   # input (double-buffered)
           + 2 * tile_i * _round_up(H, 8) * _round_up(L, 128) * 4     # projected output blocks
           + 4 * _round_up(H, 8) * _round_up(L, 128) * 4              # cls / mean / masks
           + 2 * _round_up(Fe, 8) * _round_up(H, 128) * 4             # weights
           + (8 << 20))
    vmem_limit = min(cap - (4 << 20), max(int(cap * 0.75), est))
    return tile_i, vmem_limit


def edge_fused_kernel(topk, x_ref, w_ref, b_ref, mi_ref, ml_ref,
                      eT_ref, cls_ref, mean_ref):
    """Per grid step (b, it):
         x_ref   : (1, tile_i, L, Fe)  raw edge features for this i-tile
         w_ref   : (Fe, H)             projection weight
         b_ref   : (1, H)              projection bias
         mi_ref  : (1, tile_i, 1, 1)   label mask over the tile's i-rows (zero-padded)
         ml_ref  : (1, 1, L)           full label mask over l
         eT_ref  : (1, tile_i, H, L)   projected block in [i, h, l] layout (l on lanes)
         cls_ref : (1, H, L)           CLS edge-bias row (VMEM-resident over it)
         mean_ref: (1, H, 1)           masked mean of the CLS row
    """
    it = pl.program_id(1)
    n_it = pl.num_programs(1)
    _, tile_i, L, Fe = x_ref.shape
    H = w_ref.shape[1]

    @pl.when(it == 0)
    def _():
        cls_ref[...] = jnp.zeros_like(cls_ref)

    # One MXU matmul for the whole tile: K=Fe is on lanes for x and on sublanes
    # for W, so no big-operand transpose is required.
    x = x_ref[0].reshape(tile_i * L, Fe)                       # leading-dim merge (view-like)
    y = jnp.dot(x, w_ref[...], preferred_element_type=jnp.float32) + b_ref[...]
    # Tiny transpose of the (L, H) result slabs -> lane-dense [i, h, l] layout.
    yT = jnp.swapaxes(y.reshape(tile_i, L, H), 1, 2)           # (tile_i, H, L)
    eT_ref[0] = yT                                             # single full-block store

    # CLS accumulation from the already-projected values (matches the torch
    # summation order).  where-guard: remainder-tile garbage rows and masked
    # rows (m == 0) contribute exactly 0 even if the garbage is inf/nan.
    m_i = mi_ref[0]                                            # (tile_i, 1, 1)
    cls_ref[0] += jnp.sum(jnp.where(m_i > 0.0, yT * m_i, 0.0), axis=0)

    @pl.when(it == n_it - 1)
    def _():
        m_l = ml_ref[0]                                        # (1, L)
        msum = jnp.sum(m_l)
        cls = cls_ref[0] * m_l                                 # (H, L)
        cls_ref[0] = cls
        # NOTE: all-zero mask -> division by zero (inf/nan), matching the
        # PyTorch reference behaviour.
        mean_ref[0] = jnp.sum(cls * m_l, axis=1, keepdims=True) / (topk * msum)


def edge_project_and_cls(efeature, w, b, mask, topk):
    """efeature: [B, L, L, Fe], w: [Fe, H], b: [H], mask: [B, L] float.
    Returns eT [B, L, H, L] (e[b,i,l,:] @ W, laid out [i, h, l]),
            cls_row [B, H, L], cls_mean [B, H, 1]."""
    B, L, _, Fe = efeature.shape
    H = w.shape[1]
    tile_i, vmem_limit = _edge_tiling(L, Fe, H)
    n_it = pl.cdiv(L, tile_i)
    Lp = n_it * tile_i
    # Pad ONLY the tiny i-mask (never the big efeature tensor); the remainder
    # tile's out-of-bounds reads are neutralized by the zero mask + where-guard
    # and its out-of-bounds output rows are dropped on writeback.
    mpad = jnp.pad(mask, ((0, 0), (0, Lp - L))) if Lp != L else mask
    mi = mpad.reshape(B, Lp, 1, 1)
    ml = mask.reshape(B, 1, L)
    kernel = functools.partial(edge_fused_kernel, float(topk))
    eT, cls_row, cls_mean = pl.pallas_call(
        kernel,
        out_shape=(
            jax.ShapeDtypeStruct((B, L, H, L), jnp.float32),
            jax.ShapeDtypeStruct((B, H, L), jnp.float32),
            jax.ShapeDtypeStruct((B, H, 1), jnp.float32),
        ),
        grid_spec=pltpu.PrefetchScalarGridSpec(
            num_scalar_prefetch=0,
            grid=(B, n_it),
            in_specs=[
                pl.BlockSpec((1, tile_i, L, Fe), lambda bb, it: (bb, it, 0, 0)),
                pl.BlockSpec((Fe, H), lambda bb, it: (0, 0)),
                pl.BlockSpec((1, H), lambda bb, it: (0, 0)),
                pl.BlockSpec((1, tile_i, 1, 1), lambda bb, it: (bb, it, 0, 0)),
                pl.BlockSpec((1, 1, L), lambda bb, it: (bb, 0, 0)),
            ],
            out_specs=[
                pl.BlockSpec((1, tile_i, H, L), lambda bb, it: (bb, it, 0, 0)),
                pl.BlockSpec((1, H, L), lambda bb, it: (bb, 0, 0)),
                pl.BlockSpec((1, H, 1), lambda bb, it: (bb, 0, 0)),
            ],
        ),
        compiler_params=pltpu.CompilerParams(
            dimension_semantics=("parallel", "arbitrary"),
            vmem_limit_bytes=vmem_limit,
        ),
    )(efeature, w, b.reshape(1, H), mi, ml)
    return eT, cls_row, cls_mean


# ---------------------------------------------------------------------------
# ef assembly: [[mean, cls], [cls^T, e]] sliced to [B, H, msl, msl]
# (pure sliced copies -- one windowed read + one write of the bias tensor)
# ---------------------------------------------------------------------------
def assemble_kernel(msl, H, e_ref, clsr_ref, clsc_ref, mean_ref, ef_ref):
    """Per grid step b:
         e_ref   : (1, n, H, Wl)   projected edges, [i, h, l] layout, n = msl-1
         clsr_ref: (1, H, 1, Wl)   CLS row
         clsc_ref: (1, H, Wic, 1)  CLS row as a column
         mean_ref: (1, H, 1, 1)    CLS mean
         ef_ref  : (1, H, msl, msl)
    """
    n = msl - 1
    for h in range(H):  # small static unroll over heads
        ef_ref[0, h, 1:, 1:] = e_ref[0, :, h, :n]
        ef_ref[0, h, 0:1, 1:] = clsr_ref[0, h, :, :n]
        ef_ref[0, h, 1:, 0:1] = clsc_ref[0, h, :n, :]
        ef_ref[0, h, 0:1, 0:1] = mean_ref[0, h]


def assemble_ef(e4, cls_row, cls_mean, msl):
    B, L, H, _ = e4.shape
    if msl == 1:
        return cls_mean.reshape(B, H, 1, 1)
    n = msl - 1
    # (8,128)-legal prefix windows of the inputs (avoid DMAing unused bytes).
    Wl = L if _round_up(n, 128) >= L else _round_up(n, 128)
    Wic = L if _round_up(n, 8) >= L else _round_up(n, 8)
    clsr = cls_row.reshape(B, H, 1, L)
    clsc = cls_row.reshape(B, H, L, 1)
    mean4 = cls_mean.reshape(B, H, 1, 1)

    cap = _vmem_capacity_bytes()
    est = (2 * n * _round_up(H, 8) * _round_up(Wl, 128) * 4
           + 2 * H * _round_up(msl, 8) * _round_up(msl, 128) * 4
           + (8 << 20))
    vmem_limit = min(cap - (4 << 20), max(int(cap * 0.5), est))

    kernel = functools.partial(assemble_kernel, msl, H)
    return pl.pallas_call(
        kernel,
        out_shape=jax.ShapeDtypeStruct((B, H, msl, msl), jnp.float32),
        grid_spec=pltpu.PrefetchScalarGridSpec(
            num_scalar_prefetch=0,
            grid=(B,),
            in_specs=[
                pl.BlockSpec((1, n, H, Wl), lambda bb: (bb, 0, 0, 0)),
                pl.BlockSpec((1, H, 1, Wl), lambda bb: (bb, 0, 0, 0)),
                pl.BlockSpec((1, H, Wic, 1), lambda bb: (bb, 0, 0, 0)),
                pl.BlockSpec((1, H, 1, 1), lambda bb: (bb, 0, 0, 0)),
            ],
            out_specs=pl.BlockSpec((1, H, msl, msl), lambda bb: (bb, 0, 0, 0)),
        ),
        compiler_params=pltpu.CompilerParams(
            dimension_semantics=("parallel",),
            vmem_limit_bytes=vmem_limit,
        ),
    )(e4, clsr, clsc, mean4)


# ---------------------------------------------------------------------------
# Model forward (Pallas hot path + tiny plain-JAX glue)
# ---------------------------------------------------------------------------
def model_forward(params, nfeature, efeature, label_masks, *, max_sl, topk):
    B, L, Fn = nfeature.shape
    hidden = params["node_w"].shape[1]
    m = label_masks.astype(jnp.float32)

    # --- node path: Linear(117 -> hidden), prepend CLS token, slice to max_sl
    nf = pallas_linear(
        nfeature.reshape(B * L, Fn), params["node_w"], params["node_b"]
    ).reshape(B, L, hidden)
    cls_tok = jnp.tile(params["cls_node_feature"], (B, 1, 1))
    nf = jnp.concatenate([cls_tok, nf], axis=1)[:, :max_sl, :]

    # --- edge path: fused projection + layout change + masked CLS reduction
    e4, cls_row, cls_mean = edge_project_and_cls(
        efeature, params["edge_w"], params["edge_b"], m, float(topk))

    msl = min(int(max_sl), L + 1)
    ef = assemble_ef(e4, cls_row, cls_mean, msl)

    # TODO(synk): self.encoder(...) -> (loss_mlm, logits_mlm) not implemented
    # (BertForMaskedModeling is undefined in the source module).
    return nf, ef


# ---------------------------------------------------------------------------
# Pure-JAX reference for verification
# ---------------------------------------------------------------------------
def reference_forward(params, nfeature, efeature, label_masks, *, max_sl, topk):
    B = nfeature.shape[0]
    hp = lax.Precision.HIGHEST
    nf = (
        jnp.einsum("blf,fh->blh", nfeature, params["node_w"], precision=hp)
        + params["node_b"]
    )
    cls_tok = jnp.tile(params["cls_node_feature"], (B, 1, 1))
    nf = jnp.concatenate([cls_tok, nf], axis=1)[:, :max_sl, :]

    e = (
        jnp.einsum("bijf,fh->bijh", efeature, params["edge_w"], precision=hp)
        + params["edge_b"]
    )
    eT = jnp.transpose(e, (0, 3, 1, 2))
    m = label_masks.astype(jnp.float32)
    mask2d = m[:, None, :, None] * m[:, None, None, :]
    cls = jnp.sum(eT * mask2d, axis=2, keepdims=True)
    mask1d = m[:, None, None, :]
    mean = jnp.sum(cls * mask1d, axis=3, keepdims=True) / (
        topk * jnp.sum(mask1d, axis=3, keepdims=True)
    )
    ef = jnp.concatenate([cls, eT], axis=2)
    add_ = jnp.concatenate([mean, jnp.transpose(cls, (0, 1, 3, 2))], axis=2)
    ef = jnp.concatenate([add_, ef], axis=3)[:, :, :max_sl, :max_sl]
    return nf, ef


# ---------------------------------------------------------------------------
if __name__ == "__main__":
    # Small, module-consistent shapes:
    #   num_rbf_node=16 -> node feature dim 21 + 16*6 = 117
    #   num_rbf_edge=16 -> edge feature dim 16 + 16*16 = 272
    B, L = 2, 8
    F_NODE, F_EDGE = 117, 272
    HIDDEN, HEADS = 32, 4          # bert hidden_size / num_attention_heads
    MAX_SL = 8
    TOPK = 4.0

    key = jax.random.PRNGKey(0)
    k_nf, k_ef, k_nw, k_nb, k_ew, k_eb, k_cls = jax.random.split(key, 7)

    nfeature = jax.random.normal(k_nf, (B, L, F_NODE), jnp.float32)
    efeature = jax.random.normal(k_ef, (B, L, L, F_EDGE), jnp.float32)
    # deterministic label masks: batch 0 has 6 valid positions, batch 1 has 8
    label_masks = jnp.array(
        [[1, 1, 1, 1, 1, 1, 0, 0],
         [1, 1, 1, 1, 1, 1, 1, 1]], dtype=jnp.float32)

    params = {
        "node_w": jax.random.normal(k_nw, (F_NODE, HIDDEN), jnp.float32) * 0.05,
        "node_b": jax.random.normal(k_nb, (HIDDEN,), jnp.float32) * 0.05,
        "edge_w": jax.random.normal(k_ew, (F_EDGE, HEADS), jnp.float32) * 0.05,
        "edge_b": jax.random.normal(k_eb, (HEADS,), jnp.float32) * 0.05,
        "cls_node_feature": jax.random.normal(k_cls, (1, 1, HIDDEN), jnp.float32),
    }

    fwd = jax.jit(functools.partial(model_forward, max_sl=MAX_SL, topk=TOPK))
    nf_out, ef_out = fwd(params, nfeature, efeature, label_masks)
    jax.block_until_ready((nf_out, ef_out))

    nf_ref, ef_ref = reference_forward(
        params, nfeature, efeature, label_masks, max_sl=MAX_SL, topk=TOPK)

    assert nf_out.shape == (B, MAX_SL, HIDDEN), nf_out.shape
    assert ef_out.shape == (B, HEADS, MAX_SL, MAX_SL), ef_out.shape
    assert jnp.allclose(nf_out, nf_ref, rtol=1e-3, atol=1e-3)
    assert jnp.allclose(ef_out, ef_ref, rtol=1e-3, atol=1e-3)

    print("KERNEL_OK")
</pallas_src>

<mosaic_0001>
module attributes {stable_mosaic.version = 11 : i64} {
  func.func @edge_fused_kernel(%arg0: i32, %arg1: i32, %arg2: memref<1x8x8x272xf32, #tpu.memory_space<vmem>>, %arg3: memref<272x4xf32, #tpu.memory_space<vmem>>, %arg4: memref<1x4xf32, #tpu.memory_space<vmem>>, %arg5: memref<1x8x1x1xf32, #tpu.memory_space<vmem>>, %arg6: memref<1x1x8xf32, #tpu.memory_space<vmem>>, %arg7: memref<1x8x4x8xf32, #tpu.memory_space<vmem>>, %arg8: memref<1x4x8xf32, #tpu.memory_space<vmem>>, %arg9: memref<1x4x1xf32, #tpu.memory_space<vmem>>) attributes {dimension_semantics = [#tpu.dimension_semantics<parallel>, #tpu.dimension_semantics<arbitrary>], iteration_bounds = array<i64: 2, 1>, scalar_prefetch = 0 : i64, scratch_operands = 0 : i64, tpu.core_type = #tpu.core_type<tc>, window_params = [{transform_indices = @transform_0, window_bounds = array<i64: 1, 8, 8, 272>}, {pipeline_mode = #tpu.pipeline_mode<synchronous>, transform_indices = @transform_1, window_bounds = array<i64: 272, 4>}, {pipeline_mode = #tpu.pipeline_mode<synchronous>, transform_indices = @transform_2, window_bounds = array<i64: 1, 4>}, {transform_indices = @transform_3, window_bounds = array<i64: 1, 8, 1, 1>}, {transform_indices = @transform_4, window_bounds = array<i64: 1, 1, 8>}, {transform_indices = @transform_5, window_bounds = array<i64: 1, 8, 4, 8>}, {transform_indices = @transform_6, window_bounds = array<i64: 1, 4, 8>}, {transform_indices = @transform_7, window_bounds = array<i64: 1, 4, 1>}]} {
    %c0_i32 = arith.constant 0 : i32
    %0 = arith.cmpi eq, %arg1, %c0_i32 : i32
    %1 = arith.extui %0 : i1 to i32
    %c0_i32_0 = arith.constant 0 : i32
    %2 = arith.cmpi ne, %1, %c0_i32_0 : i32
    scf.if %2 {
      %cst_27 = arith.constant 0.000000e+00 : f32
      %36 = vector.broadcast %cst_27 : f32 to vector<1x4x8xf32>
      %c0_28 = arith.constant 0 : index
      %c0_29 = arith.constant 0 : index
      %c0_30 = arith.constant 0 : index
      %37 = vector.load %arg8[%c0_28, %c0_29, %c0_30] : memref<1x4x8xf32, #tpu.memory_space<vmem>>, vector<1x4x8xf32>
      tpu.vector_store %arg8[%c0_28, %c0_29, %c0_30], %36 {strides = array<i32>} : memref<1x4x8xf32, #tpu.memory_space<vmem>>, vector<1x4x8xf32>,
    } else {
    }
    %c0 = arith.constant 0 : index
    %c0_1 = arith.constant 0 : index
    %c0_2 = arith.constant 0 : index
    %c0_3 = arith.constant 0 : index
    %3 = vector.load %arg2[%c0, %c0_1, %c0_2, %c0_3] : memref<1x8x8x272xf32, #tpu.memory_space<vmem>>, vector<1x8x8x272xf32>
    %4 = vector.shape_cast %3 : vector<1x8x8x272xf32> to vector<8x8x272xf32>
    %5 = vector.shape_cast %4 : vector<8x8x272xf32> to vector<64x272xf32>
    %c0_4 = arith.constant 0 : index
    %c0_5 = arith.constant 0 : index
    %6 = vector.load %arg3[%c0_4, %c0_5] : memref<272x4xf32, #tpu.memory_space<vmem>>, vector<272x4xf32>
    %cst = arith.constant dense<0.000000e+00> : vector<64x4xf32>
    %7 = tpu.matmul %5, %6, %cst {dimension_numbers = #tpu.dot_dimension_numbers<[1], [0], [0], [1], [0, 0, 1, 1], [], []>} : vector<64x272xf32>, vector<272x4xf32>, vector<64x4xf32> -> vector<64x4xf32>
    %c0_6 = arith.constant 0 : index
    %c0_7 = arith.constant 0 : index
    %8 = vector.load %arg4[%c0_6, %c0_7] : memref<1x4xf32, #tpu.memory_space<vmem>>, vector<1x4xf32>
    %9 = vector.broadcast %8 : vector<1x4xf32> to vector<64x4xf32>
    %10 = arith.addf %7, %9 : vector<64x4xf32>
    %11 = vector.shape_cast %10 : vector<64x4xf32> to vector<8x8x4xf32>
    %12 = tpu.transpose %11, [0, 2, 1] : vector<8x8x4xf32> -> vector<8x4x8xf32>
    %c0_8 = arith.constant 0 : index
    %c0_9 = arith.constant 0 : index
    %c0_10 = arith.constant 0 : index
    %c0_11 = arith.constant 0 : index
    %13 = vector.load %arg7[%c0_8, %c0_9, %c0_10, %c0_11] : memref<1x8x4x8xf32, #tpu.memory_space<vmem>>, vector<1x8x4x8xf32>
    %14 = vector.shape_cast %13 : vector<1x8x4x8xf32> to vector<8x4x8xf32>
    %15 = vector.shape_cast %12 : vector<8x4x8xf32> to vector<1x8x4x8xf32>
    tpu.vector_store %arg7[%c0_8, %c0_9, %c0_10, %c0_11], %15 {strides = array<i32>} : memref<1x8x4x8xf32, #tpu.memory_space<vmem>>, vector<1x8x4x8xf32>,
    %c0_12 = arith.constant 0 : index
    %c0_13 = arith.constant 0 : index
    %c0_14 = arith.constant 0 : index
    %c0_15 = arith.constant 0 : index
    %16 = vector.load %arg5[%c0_12, %c0_13, %c0_14, %c0_15] : memref<1x8x1x1xf32, #tpu.memory_space<vmem>>, vector<1x8x1x1xf32>
    %17 = vector.shape_cast %16 : vector<1x8x1x1xf32> to vector<8x1x1xf32>
    %c0_16 = arith.constant 0 : index
    %c0_17 = arith.constant 0 : index
    %c0_18 = arith.constant 0 : index
    %18 = vector.load %arg8[%c0_16, %c0_17, %c0_18] : memref<1x4x8xf32, #tpu.memory_space<vmem>>, vector<1x4x8xf32>
    %19 = vector.shape_cast %18 : vector<1x4x8xf32> to vector<4x8xf32>
    %cst_19 = arith.constant 0.000000e+00 : f32
    %20 = vector.broadcast %cst_19 : f32 to vector<8x1x1xf32>
    %21 = arith.cmpf ogt, %17, %20 : vector<8x1x1xf32>
    %22 = vector.broadcast %17 : vector<8x1x1xf32> to vector<8x4x8xf32>
    %23 = arith.mulf %12, %22 : vector<8x4x8xf32>
    %cst_20 = arith.constant 0.000000e+00 : f32
    %24 = vector.shape_cast %21 : vector<8x1x1xi1> to vector<8x1x1xi1>
    %25 = vector.broadcast %24 : vector<8x1x1xi1> to vector<8x4x8xi1>
    %26 = vector.broadcast %cst_20 : f32 to vector<8x4x8xf32>
    %27 = arith.select %25, %23, %26 : vector<8x4x8xi1>, vector<8x4x8xf32>
    %cst_21 = arith.constant dense<0.000000e+00> : vector<4x8xf32>
    %28 = vector.multi_reduction <add>, %27, %cst_21 [0] : vector<8x4x8xf32> to vector<4x8xf32>
    %29 = arith.addf %19, %28 : vector<4x8xf32>
    %c0_22 = arith.constant 0 : index
    %c0_23 = arith.constant 0 : index
    %c0_24 = arith.constant 0 : index
    %30 = vector.load %arg8[%c0_22, %c0_23, %c0_24] : memref<1x4x8xf32, #tpu.memory_space<vmem>>, vector<1x4x8xf32>
    %31 = vector.shape_cast %30 : vector<1x4x8xf32> to vector<4x8xf32>
    %32 = vector.shape_cast %29 : vector<4x8xf32> to vector<1x4x8xf32>
    tpu.vector_store %arg8[%c0_22, %c0_23, %c0_24], %32 {strides = array<i32>} : memref<1x4x8xf32, #tpu.memory_space<vmem>>, vector<1x4x8xf32>,
    %c0_i32_25 = arith.constant 0 : i32
    %33 = arith.cmpi eq, %arg1, %c0_i32_25 : i32
    %34 = arith.extui %33 : i1 to i32
    %c0_i32_26 = arith.constant 0 : i32
    %35 = arith.cmpi ne, %34, %c0_i32_26 : i32
    scf.if %35 {
      %c0_27 = arith.constant 0 : index
      %c0_28 = arith.constant 0 : index
      %c0_29 = arith.constant 0 : index
      %36 = vector.load %arg6[%c0_27, %c0_28, %c0_29] : memref<1x1x8xf32, #tpu.memory_space<vmem>>, vector<1x1x8xf32>
      %37 = vector.shape_cast %36 : vector<1x1x8xf32> to vector<1x8xf32>
      %38 = vector.shape_cast %37 : vector<1x8xf32> to vector<1x1x8xf32>
      %cst_30 = arith.constant dense<0.000000e+00> : vector<1xf32>
      %39 = vector.multi_reduction <add>, %38, %cst_30 [1, 2] : vector<1x1x8xf32> to vector<1xf32>
      %40 = vector.shape_cast %39 : vector<1xf32> to vector<1x1x1xf32>
      %41 = vector.extract %40[0, 0, 0] : f32 from vector<1x1x1xf32>
      %c0_31 = arith.constant 0 : index
      %c0_32 = arith.constant 0 : index
      %c0_33 = arith.constant 0 : index
      %42 = vector.load %arg8[%c0_31, %c0_32, %c0_33] : memref<1x4x8xf32, #tpu.memory_space<vmem>>, vector<1x4x8xf32>
      %43 = vector.shape_cast %42 : vector<1x4x8xf32> to vector<4x8xf32>
      %44 = vector.broadcast %37 : vector<1x8xf32> to vector<4x8xf32>
      %45 = arith.mulf %43, %44 : vector<4x8xf32>
      %c0_34 = arith.constant 0 : index
      %c0_35 = arith.constant 0 : index
      %c0_36 = arith.constant 0 : index
      %46 = vector.load %arg8[%c0_34, %c0_35, %c0_36] : memref<1x4x8xf32, #tpu.memory_space<vmem>>, vector<1x4x8xf32>
      %47 = vector.shape_cast %46 : vector<1x4x8xf32> to vector<4x8xf32>
      %48 = vector.shape_cast %45 : vector<4x8xf32> to vector<1x4x8xf32>
      tpu.vector_store %arg8[%c0_34, %c0_35, %c0_36], %48 {strides = array<i32>} : memref<1x4x8xf32, #tpu.memory_space<vmem>>, vector<1x4x8xf32>,
      %49 = vector.broadcast %37 : vector<1x8xf32> to vector<4x8xf32>
      %50 = arith.mulf %45, %49 : vector<4x8xf32>
      %cst_37 = arith.constant dense<0.000000e+00> : vector<4xf32>
      %51 = vector.multi_reduction <add>, %50, %cst_37 [1] : vector<4x8xf32> to vector<4xf32>
      %52 = vector.shape_cast %51 : vector<4xf32> to vector<4x1xf32>
      %cst_38 = arith.constant 4.000000e+00 : f32
      %53 = arith.mulf %cst_38, %41 : f32
      %54 = vector.broadcast %53 : f32 to vector<4x1xf32>
      %55 = arith.divf %52, %54 : vector<4x1xf32>
      %c0_39 = arith.constant 0 : index
      %c0_40 = arith.constant 0 : index
      %c0_41 = arith.constant 0 : index
      %56 = vector.load %arg9[%c0_39, %c0_40, %c0_41] : memref<1x4x1xf32, #tpu.memory_space<vmem>>, vector<1x4x1xf32>
      %57 = vector.shape_cast %56 : vector<1x4x1xf32> to vector<4x1xf32>
      %58 = vector.shape_cast %55 : vector<4x1xf32> to vector<1x4x1xf32>
      tpu.vector_store %arg9[%c0_39, %c0_40, %c0_41], %58 {strides = array<i32>} : memref<1x4x1xf32, #tpu.memory_space<vmem>>, vector<1x4x1xf32>,
    } else {
    }
    return
  }
  func.func @transform_0(%arg0: i32, %arg1: i32) -> (i32, i32, i32, i32) {
    %c0_i32 = arith.constant 0 : i32
    %c0_i32_0 = arith.constant 0 : i32
    %c0_i32_1 = arith.constant 0 : i32
    return %arg0, %arg1, %c0_i32, %c0_i32_0 : i32, i32, i32, i32
  }
  func.func @transform_1(%arg0: i32, %arg1: i32) -> (i32, i32) {
    %c0_i32 = arith.constant 0 : i32
    %c0_i32_0 = arith.constant 0 : i32
    %c0_i32_1 = arith.constant 0 : i32
    return %c0_i32, %c0_i32_0 : i32, i32
  }
  func.func @transform_2(%arg0: i32, %arg1: i32) -> (i32, i32) {
    %c0_i32 = arith.constant 0 : i32
    %c0_i32_0 = arith.constant 0 : i32
    %c0_i32_1 = arith.constant 0 : i32
    return %c0_i32, %c0_i32_0 : i32, i32
  }
  func.func @transform_3(%arg0: i32, %arg1: i32) -> (i32, i32, i32, i32) {
    %c0_i32 = arith.constant 0 : i32
    %c0_i32_0 = arith.constant 0 : i32
    %c0_i32_1 = arith.constant 0 : i32
    return %arg0, %arg1, %c0_i32, %c0_i32_0 : i32, i32, i32, i32
  }
  func.func @transform_4(%arg0: i32, %arg1: i32) -> (i32, i32, i32) {
    %c0_i32 = arith.constant 0 : i32
    %c0_i32_0 = arith.constant 0 : i32
    %c0_i32_1 = arith.constant 0 : i32
    return %arg0, %c0_i32, %c0_i32_0 : i32, i32, i32
  }
  func.func @transform_5(%arg0: i32, %arg1: i32) -> (i32, i32, i32, i32) {
    %c0_i32 = arith.constant 0 : i32
    %c0_i32_0 = arith.constant 0 : i32
    %c0_i32_1 = arith.constant 0 : i32
    return %arg0, %arg1, %c0_i32, %c0_i32_0 : i32, i32, i32, i32
  }
  func.func @transform_6(%arg0: i32, %arg1: i32) -> (i32, i32, i32) {
    %c0_i32 = arith.constant 0 : i32
    %c0_i32_0 = arith.constant 0 : i32
    %c0_i32_1 = arith.constant 0 : i32
    return %arg0, %c0_i32, %c0_i32_0 : i32, i32, i32
  }
  func.func @transform_7(%arg0: i32, %arg1: i32) -> (i32, i32, i32) {
    %c0_i32 = arith.constant 0 : i32
    %c0_i32_0 = arith.constant 0 : i32
    %c0_i32_1 = arith.constant 0 : i32
    return %arg0, %c0_i32, %c0_i32_0 : i32, i32, i32
  }
}

module attributes {stable_mosaic.version = 11 : i64} {
  func.func @assemble_kernel(%arg0: i32, %arg1: memref<1x7x4x8xf32, #tpu.memory_space<vmem>>, %arg2: memref<1x4x1x8xf32, #tpu.memory_space<vmem>>, %arg3: memref<1x4x8x1xf32, #tpu.memory_space<vmem>>, %arg4: memref<1x4x1x1xf32, #tpu.memory_space<vmem>>, %arg5: memref<1x4x8x8xf32, #tpu.memory_space<vmem>>) attributes {dimension_semantics = [#tpu.dimension_semantics<parallel>], iteration_bounds = array<i64: 2>, scalar_prefetch = 0 : i64, scratch_operands = 0 : i64, tpu.core_type = #tpu.core_type<tc>, window_params = [{transform_indices = @transform_0, window_bounds = array<i64: 1, 7, 4, 8>}, {transform_indices = @transform_1, window_bounds = array<i64: 1, 4, 1, 8>}, {transform_indices = @transform_2, window_bounds = array<i64: 1, 4, 8, 1>}, {transform_indices = @transform_3, window_bounds = array<i64: 1, 4, 1, 1>}, {transform_indices = @transform_4, window_bounds = array<i64: 1, 4, 8, 8>}]} {
    %c0 = arith.constant 0 : index
    %c0_0 = arith.constant 0 : index
    %c0_1 = arith.constant 0 : index
    %c0_2 = arith.constant 0 : index
    %0 = vector.load %arg1[%c0, %c0_0, %c0_1, %c0_2] : memref<1x7x4x8xf32, #tpu.memory_space<vmem>>, vector<1x7x1x7xf32>
    %1 = vector.shape_cast %0 : vector<1x7x1x7xf32> to vector<7x7xf32>
    %c0_3 = arith.constant 0 : index
    %c0_4 = arith.constant 0 : index
    %c1 = arith.constant 1 : index
    %c1_5 = arith.constant 1 : index
    %2 = vector.load %arg5[%c0_3, %c0_4, %c1, %c1_5] : memref<1x4x8x8xf32, #tpu.memory_space<vmem>>, vector<1x1x7x7xf32>
    %3 = vector.shape_cast %2 : vector<1x1x7x7xf32> to vector<7x7xf32>
    %4 = vector.shape_cast %1 : vector<7x7xf32> to vector<1x1x7x7xf32>
    tpu.vector_store %arg5[%c0_3, %c0_4, %c1, %c1_5], %4 {strides = array<i32>} : memref<1x4x8x8xf32, #tpu.memory_space<vmem>>, vector<1x1x7x7xf32>,
    %c0_6 = arith.constant 0 : index
    %c0_7 = arith.constant 0 : index
    %c0_8 = arith.constant 0 : index
    %c0_9 = arith.constant 0 : index
    %5 = vector.load %arg2[%c0_6, %c0_7, %c0_8, %c0_9] : memref<1x4x1x8xf32, #tpu.memory_space<vmem>>, vector<1x1x1x7xf32>
    %6 = vector.shape_cast %5 : vector<1x1x1x7xf32> to vector<1x7xf32>
    %c0_10 = arith.constant 0 : index
    %c0_11 = arith.constant 0 : index
    %c0_12 = arith.constant 0 : index
    %c1_13 = arith.constant 1 : index
    %7 = vector.load %arg5[%c0_10, %c0_11, %c0_12, %c1_13] : memref<1x4x8x8xf32, #tpu.memory_space<vmem>>, vector<1x1x1x7xf32>
    %8 = vector.shape_cast %7 : vector<1x1x1x7xf32> to vector<1x7xf32>
    %9 = vector.shape_cast %6 : vector<1x7xf32> to vector<1x1x1x7xf32>
    tpu.vector_store %arg5[%c0_10, %c0_11, %c0_12, %c1_13], %9 {strides = array<i32>} : memref<1x4x8x8xf32, #tpu.memory_space<vmem>>, vector<1x1x1x7xf32>,
    %c0_14 = arith.constant 0 : index
    %c0_15 = arith.constant 0 : index
    %c0_16 = arith.constant 0 : index
    %c0_17 = arith.constant 0 : index
    %10 = vector.load %arg3[%c0_14, %c0_15, %c0_16, %c0_17] : memref<1x4x8x1xf32, #tpu.memory_space<vmem>>, vector<1x1x7x1xf32>
    %11 = vector.shape_cast %10 : vector<1x1x7x1xf32> to vector<7x1xf32>
    %c0_18 = arith.constant 0 : index
    %c0_19 = arith.constant 0 : index
    %c1_20 = arith.constant 1 : index
    %c0_21 = arith.constant 0 : index
    %12 = vector.load %arg5[%c0_18, %c0_19, %c1_20, %c0_21] : memref<1x4x8x8xf32, #tpu.memory_space<vmem>>, vector<1x1x7x1xf32>
    %13 = vector.shape_cast %12 : vector<1x1x7x1xf32> to vector<7x1xf32>
    %14 = vector.shape_cast %11 : vector<7x1xf32> to vector<1x1x7x1xf32>
    tpu.vector_store %arg5[%c0_18, %c0_19, %c1_20, %c0_21], %14 {strides = array<i32>} : memref<1x4x8x8xf32, #tpu.memory_space<vmem>>, vector<1x1x7x1xf32>,
    %c0_22 = arith.constant 0 : index
    %c0_23 = arith.constant 0 : index
    %c0_24 = arith.constant 0 : index
    %c0_25 = arith.constant 0 : index
    %15 = vector.load %arg4[%c0_22, %c0_23, %c0_24, %c0_25] : memref<1x4x1x1xf32, #tpu.memory_space<vmem>>, vector<1x1x1x1xf32>
    %16 = vector.shape_cast %15 : vector<1x1x1x1xf32> to vector<1x1xf32>
    %c0_26 = arith.constant 0 : index
    %c0_27 = arith.constant 0 : index
    %c0_28 = arith.constant 0 : index
    %c0_29 = arith.constant 0 : index
    %17 = vector.load %arg5[%c0_26, %c0_27, %c0_28, %c0_29] : memref<1x4x8x8xf32, #tpu.memory_space<vmem>>, vector<1x1x1x1xf32>
    %18 = vector.shape_cast %17 : vector<1x1x1x1xf32> to vector<1x1xf32>
    %19 = vector.shape_cast %16 : vector<1x1xf32> to vector<1x1x1x1xf32>
    tpu.vector_store %arg5[%c0_26, %c0_27, %c0_28, %c0_29], %19 {strides = array<i32>} : memref<1x4x8x8xf32, #tpu.memory_space<vmem>>, vector<1x1x1x1xf32>,
    %c0_30 = arith.constant 0 : index
    %c0_31 = arith.constant 0 : index
    %c1_32 = arith.constant 1 : index
    %c0_33 = arith.constant 0 : index
    %20 = vector.load %arg1[%c0_30, %c0_31, %c1_32, %c0_33] : memref<1x7x4x8xf32, #tpu.memory_space<vmem>>, vector<1x7x1x7xf32>
    %21 = vector.shape_cast %20 : vector<1x7x1x7xf32> to vector<7x7xf32>
    %c0_34 = arith.constant 0 : index
    %c1_35 = arith.constant 1 : index
    %c1_36 = arith.constant 1 : index
    %c1_37 = arith.constant 1 : index
    %22 = vector.load %arg5[%c0_34, %c1_35, %c1_36, %c1_37] : memref<1x4x8x8xf32, #tpu.memory_space<vmem>>, vector<1x1x7x7xf32>
    %23 = vector.shape_cast %22 : vector<1x1x7x7xf32> to vector<7x7xf32>
    %24 = vector.shape_cast %21 : vector<7x7xf32> to vector<1x1x7x7xf32>
    tpu.vector_store %arg5[%c0_34, %c1_35, %c1_36, %c1_37], %24 {strides = array<i32>} : memref<1x4x8x8xf32, #tpu.memory_space<vmem>>, vector<1x1x7x7xf32>,
    %c0_38 = arith.constant 0 : index
    %c1_39 = arith.constant 1 : index
    %c0_40 = arith.constant 0 : index
    %c0_41 = arith.constant 0 : index
    %25 = vector.load %arg2[%c0_38, %c1_39, %c0_40, %c0_41] : memref<1x4x1x8xf32, #tpu.memory_space<vmem>>, vector<1x1x1x7xf32>
    %26 = vector.shape_cast %25 : vector<1x1x1x7xf32> to vector<1x7xf32>
    %c0_42 = arith.constant 0 : index
    %c1_43 = arith.constant 1 : index
    %c0_44 = arith.constant 0 : index
    %c1_45 = arith.constant 1 : index
    %27 = vector.load %arg5[%c0_42, %c1_43, %c0_44, %c1_45] : memref<1x4x8x8xf32, #tpu.memory_space<vmem>>, vector<1x1x1x7xf32>
    %28 = vector.shape_cast %27 : vector<1x1x1x7xf32> to vector<1x7xf32>
    %29 = vector.shape_cast %26 : vector<1x7xf32> to vector<1x1x1x7xf32>
    tpu.vector_store %arg5[%c0_42, %c1_43, %c0_44, %c1_45], %29 {strides = array<i32>} : memref<1x4x8x8xf32, #tpu.memory_space<vmem>>, vector<1x1x1x7xf32>,
    %c0_46 = arith.constant 0 : index
    %c1_47 = arith.constant 1 : index
    %c0_48 = arith.constant 0 : index
    %c0_49 = arith.constant 0 : index
    %30 = vector.load %arg3[%c0_46, %c1_47, %c0_48, %c0_49] : memref<1x4x8x1xf32, #tpu.memory_space<vmem>>, vector<1x1x7x1xf32>
    %31 = vector.shape_cast %30 : vector<1x1x7x1xf32> to vector<7x1xf32>
    %c0_50 = arith.constant 0 : index
    %c1_51 = arith.constant 1 : index
    %c1_52 = arith.constant 1 : index
    %c0_53 = arith.constant 0 : index
    %32 = vector.load %arg5[%c0_50, %c1_51, %c1_52, %c0_53] : memref<1x4x8x8xf32, #tpu.memory_space<vmem>>, vector<1x1x7x1xf32>
    %33 = vector.shape_cast %32 : vector<1x1x7x1xf32> to vector<7x1xf32>
    %34 = vector.shape_cast %31 : vector<7x1xf32> to vector<1x1x7x1xf32>
    tpu.vector_store %arg5[%c0_50, %c1_51, %c1_52, %c0_53], %34 {strides = array<i32>} : memref<1x4x8x8xf32, #tpu.memory_space<vmem>>, vector<1x1x7x1xf32>,
    %c0_54 = arith.constant 0 : index
    %c1_55 = arith.constant 1 : index
    %c0_56 = arith.constant 0 : index
    %c0_57 = arith.constant 0 : index
    %35 = vector.load %arg4[%c0_54, %c1_55, %c0_56, %c0_57] : memref<1x4x1x1xf32, #tpu.memory_space<vmem>>, vector<1x1x1x1xf32>
    %36 = vector.shape_cast %35 : vector<1x1x1x1xf32> to vector<1x1xf32>
    %c0_58 = arith.constant 0 : index
    %c1_59 = arith.constant 1 : index
    %c0_60 = arith.constant 0 : index
    %c0_61 = arith.constant 0 : index
    %37 = vector.load %arg5[%c0_58, %c1_59, %c0_60, %c0_61] : memref<1x4x8x8xf32, #tpu.memory_space<vmem>>, vector<1x1x1x1xf32>
    %38 = vector.shape_cast %37 : vector<1x1x1x1xf32> to vector<1x1xf32>
    %39 = vector.shape_cast %36 : vector<1x1xf32> to vector<1x1x1x1xf32>
    tpu.vector_store %arg5[%c0_58, %c1_59, %c0_60, %c0_61], %39 {strides = array<i32>} : memref<1x4x8x8xf32, #tpu.memory_space<vmem>>, vector<1x1x1x1xf32>,
    %c0_62 = arith.constant 0 : index
    %c0_63 = arith.constant 0 : index
    %c2 = arith.constant 2 : index
    %c0_64 = arith.constant 0 : index
    %40 = vector.load %arg1[%c0_62, %c0_63, %c2, %c0_64] : memref<1x7x4x8xf32, #tpu.memory_space<vmem>>, vector<1x7x1x7xf32>
    %41 = vector.shape_cast %40 : vector<1x7x1x7xf32> to vector<7x7xf32>
    %c0_65 = arith.constant 0 : index
    %c2_66 = arith.constant 2 : index
    %c1_67 = arith.constant 1 : index
    %c1_68 = arith.constant 1 : index
    %42 = vector.load %arg5[%c0_65, %c2_66, %c1_67, %c1_68] : memref<1x4x8x8xf32, #tpu.memory_space<vmem>>, vector<1x1x7x7xf32>
    %43 = vector.shape_cast %42 : vector<1x1x7x7xf32> to vector<7x7xf32>
    %44 = vector.shape_cast %41 : vector<7x7xf32> to vector<1x1x7x7xf32>
    tpu.vector_store %arg5[%c0_65, %c2_66, %c1_67, %c1_68], %44 {strides = array<i32>} : memref<1x4x8x8xf32, #tpu.memory_space<vmem>>, vector<1x1x7x7xf32>,
    %c0_69 = arith.constant 0 : index
    %c2_70 = arith.constant 2 : index
    %c0_71 = arith.constant 0 : index
    %c0_72 = arith.constant 0 : index
    %45 = vector.load %arg2[%c0_69, %c2_70, %c0_71, %c0_72] : memref<1x4x1x8xf32, #tpu.memory_space<vmem>>, vector<1x1x1x7xf32>
    %46 = vector.shape_cast %45 : vector<1x1x1x7xf32> to vector<1x7xf32>
    %c0_73 = arith.constant 0 : index
    %c2_74 = arith.constant 2 : index
    %c0_75 = arith.constant 0 : index
    %c1_76 = arith.constant 1 : index
    %47 = vector.load %arg5[%c0_73, %c2_74, %c0_75, %c1_76] : memref<1x4x8x8xf32, #tpu.memory_space<vmem>>, vector<1x1x1x7xf32>
    %48 = vector.shape_cast %47 : vector<1x1x1x7xf32> to vector<1x7xf32>
    %49 = vector.shape_cast %46 : vector<1x7xf32> to vector<1x1x1x7xf32>
    tpu.vector_store %arg5[%c0_73, %c2_74, %c0_75, %c1_76], %49 {strides = array<i32>} : memref<1x4x8x8xf32, #tpu.memory_space<vmem>>, vector<1x1x1x7xf32>,
    %c0_77 = arith.constant 0 : index
    %c2_78 = arith.constant 2 : index
    %c0_79 = arith.constant 0 : index
    %c0_80 = arith.constant 0 : index
    %50 = vector.load %arg3[%c0_77, %c2_78, %c0_79, %c0_80] : memref<1x4x8x1xf32, #tpu.memory_space<vmem>>, vector<1x1x7x1xf32>
    %51 = vector.shape_cast %50 : vector<1x1x7x1xf32> to vector<7x1xf32>
    %c0_81 = arith.constant 0 : index
    %c2_82 = arith.constant 2 : index
    %c1_83 = arith.constant 1 : index
    %c0_84 = arith.constant 0 : index
    %52 = vector.load %arg5[%c0_81, %c2_82, %c1_83, %c0_84] : memref<1x4x8x8xf32, #tpu.memory_space<vmem>>, vector<1x1x7x1xf32>
    %53 = vector.shape_cast %52 : vector<1x1x7x1xf32> to vector<7x1xf32>
    %54 = vector.shape_cast %51 : vector<7x1xf32> to vector<1x1x7x1xf32>
    tpu.vector_store %arg5[%c0_81, %c2_82, %c1_83, %c0_84], %54 {strides = array<i32>} : memref<1x4x8x8xf32, #tpu.memory_space<vmem>>, vector<1x1x7x1xf32>,
    %c0_85 = arith.constant 0 : index
    %c2_86 = arith.constant 2 : index
    %c0_87 = arith.constant 0 : index
    %c0_88 = arith.constant 0 : index
    %55 = vector.load %arg4[%c0_85, %c2_86, %c0_87, %c0_88] : memref<1x4x1x1xf32, #tpu.memory_space<vmem>>, vector<1x1x1x1xf32>
    %56 = vector.shape_cast %55 : vector<1x1x1x1xf32> to vector<1x1xf32>
    %c0_89 = arith.constant 0 : index
    %c2_90 = arith.constant 2 : index
    %c0_91 = arith.constant 0 : index
    %c0_92 = arith.constant 0 : index
    %57 = vector.load %arg5[%c0_89, %c2_90, %c0_91, %c0_92] : memref<1x4x8x8xf32, #tpu.memory_space<vmem>>, vector<1x1x1x1xf32>
    %58 = vector.shape_cast %57 : vector<1x1x1x1xf32> to vector<1x1xf32>
    %59 = vector.shape_cast %56 : vector<1x1xf32> to vector<1x1x1x1xf32>
    tpu.vector_store %arg5[%c0_89, %c2_90, %c0_91, %c0_92], %59 {strides = array<i32>} : memref<1x4x8x8xf32, #tpu.memory_space<vmem>>, vector<1x1x1x1xf32>,
    %c0_93 = arith.constant 0 : index
    %c0_94 = arith.constant 0 : index
    %c3 = arith.constant 3 : index
    %c0_95 = arith.constant 0 : index
    %60 = vector.load %arg1[%c0_93, %c0_94, %c3, %c0_95] : memref<1x7x4x8xf32, #tpu.memory_space<vmem>>, vector<1x7x1x7xf32>
    %61 = vector.shape_cast %60 : vector<1x7x1x7xf32> to vector<7x7xf32>
    %c0_96 = arith.constant 0 : index
    %c3_97 = arith.constant 3 : index
    %c1_98 = arith.constant 1 : index
    %c1_99 = arith.constant 1 : index
    %62 = vector.load %arg5[%c0_96, %c3_97, %c1_98, %c1_99] : memref<1x4x8x8xf32, #tpu.memory_space<vmem>>, vector<1x1x7x7xf32>
    %63 = vector.shape_cast %62 : vector<1x1x7x7xf32> to vector<7x7xf32>
    %64 = vector.shape_cast %61 : vector<7x7xf32> to vector<1x1x7x7xf32>
    tpu.vector_store %arg5[%c0_96, %c3_97, %c1_98, %c1_99], %64 {strides = array<i32>} : memref<1x4x8x8xf32, #tpu.memory_space<vmem>>, vector<1x1x7x7xf32>,
    %c0_100 = arith.constant 0 : index
    %c3_101 = arith.constant 3 : index
    %c0_102 = arith.constant 0 : index
    %c0_103 = arith.constant 0 : index
    %65 = vector.load %arg2[%c0_100, %c3_101, %c0_102, %c0_103] : memref<1x4x1x8xf32, #tpu.memory_space<vmem>>, vector<1x1x1x7xf32>
    %66 = vector.shape_cast %65 : vector<1x1x1x7xf32> to vector<1x7xf32>
    %c0_104 = arith.constant 0 : index
    %c3_105 = arith.constant 3 : index
    %c0_106 = arith.constant 0 : index
    %c1_107 = arith.constant 1 : index
    %67 = vector.load %arg5[%c0_104, %c3_105, %c0_106, %c1_107] : memref<1x4x8x8xf32, #tpu.memory_space<vmem>>, vector<1x1x1x7xf32>
    %68 = vector.shape_cast %67 : vector<1x1x1x7xf32> to vector<1x7xf32>
    %69 = vector.shape_cast %66 : vector<1x7xf32> to vector<1x1x1x7xf32>
    tpu.vector_store %arg5[%c0_104, %c3_105, %c0_106, %c1_107], %69 {strides = array<i32>} : memref<1x4x8x8xf32, #tpu.memory_space<vmem>>, vector<1x1x1x7xf32>,
    %c0_108 = arith.constant 0 : index
    %c3_109 = arith.constant 3 : index
    %c0_110 = arith.constant 0 : index
    %c0_111 = arith.constant 0 : index
    %70 = vector.load %arg3[%c0_108, %c3_109, %c0_110, %c0_111] : memref<1x4x8x1xf32, #tpu.memory_space<vmem>>, vector<1x1x7x1xf32>
    %71 = vector.shape_cast %70 : vector<1x1x7x1xf32> to vector<7x1xf32>
    %c0_112 = arith.constant 0 : index
    %c3_113 = arith.constant 3 : index
    %c1_114 = arith.constant 1 : index
    %c0_115 = arith.constant 0 : index
    %72 = vector.load %arg5[%c0_112, %c3_113, %c1_114, %c0_115] : memref<1x4x8x8xf32, #tpu.memory_space<vmem>>, vector<1x1x7x1xf32>
    %73 = vector.shape_cast %72 : vector<1x1x7x1xf32> to vector<7x1xf32>
    %74 = vector.shape_cast %71 : vector<7x1xf32> to vector<1x1x7x1xf32>
    tpu.vector_store %arg5[%c0_112, %c3_113, %c1_114, %c0_115], %74 {strides = array<i32>} : memref<1x4x8x8xf32, #tpu.memory_space<vmem>>, vector<1x1x7x1xf32>,
    %c0_116 = arith.constant 0 : index
    %c3_117 = arith.constant 3 : index
    %c0_118 = arith.constant 0 : index
    %c0_119 = arith.constant 0 : index
    %75 = vector.load %arg4[%c0_116, %c3_117, %c0_118, %c0_119] : memref<1x4x1x1xf32, #tpu.memory_space<vmem>>, vector<1x1x1x1xf32>
    %76 = vector.shape_cast %75 : vector<1x1x1x1xf32> to vector<1x1xf32>
    %c0_120 = arith.constant 0 : index
    %c3_121 = arith.constant 3 : index
    %c0_122 = arith.constant 0 : index
    %c0_123 = arith.constant 0 : index
    %77 = vector.load %arg5[%c0_120, %c3_121, %c0_122, %c0_123] : memref<1x4x8x8xf32, #tpu.memory_space<vmem>>, vector<1x1x1x1xf32>
    %78 = vector.shape_cast %77 : vector<1x1x1x1xf32> to vector<1x1xf32>
    %79 = vector.shape_cast %76 : vector<1x1xf32> to vector<1x1x1x1xf32>
    tpu.vector_store %arg5[%c0_120, %c3_121, %c0_122, %c0_123], %79 {strides = array<i32>} : memref<1x4x8x8xf32, #tpu.memory_space<vmem>>, vector<1x1x1x1xf32>,
    return
  }
  func.func @transform_0(%arg0: i32) -> (i32, i32, i32, i32) {
    %c0_i32 = arith.constant 0 : i32
    %c0_i32_0 = arith.constant 0 : i32
    %c0_i32_1 = arith.constant 0 : i32
    %c0_i32_2 = arith.constant 0 : i32
    return %arg0, %c0_i32, %c0_i32_0, %c0_i32_1 : i32, i32, i32, i32
  }
  func.func @transform_1(%arg0: i32) -> (i32, i32, i32, i32) {
    %c0_i32 = arith.constant 0 : i32
    %c0_i32_0 = arith.constant 0 : i32
    %c0_i32_1 = arith.constant 0 : i32
    %c0_i32_2 = arith.constant 0 : i32
    return %arg0, %c0_i32, %c0_i32_0, %c0_i32_1 : i32, i32, i32, i32
  }
  func.func @transform_2(%arg0: i32) -> (i32, i32, i32, i32) {
    %c0_i32 = arith.constant 0 : i32
    %c0_i32_0 = arith.constant 0 : i32
    %c0_i32_1 = arith.constant 0 : i32
    %c0_i32_2 = arith.constant 0 : i32
    return %arg0, %c0_i32, %c0_i32_0, %c0_i32_1 : i32, i32, i32, i32
  }
  func.func @transform_3(%arg0: i32) -> (i32, i32, i32, i32) {
    %c0_i32 = arith.constant 0 : i32
    %c0_i32_0 = arith.constant 0 : i32
    %c0_i32_1 = arith.constant 0 : i32
    %c0_i32_2 = arith.constant 0 : i32
    return %arg0, %c0_i32, %c0_i32_0, %c0_i32_1 : i32, i32, i32, i32
  }
  func.func @transform_4(%arg0: i32) -> (i32, i32, i32, i32) {
    %c0_i32 = arith.constant 0 : i32
    %c0_i32_0 = arith.constant 0 : i32
    %c0_i32_1 = arith.constant 0 : i32
    %c0_i32_2 = arith.constant 0 : i32
    return %arg0, %c0_i32, %c0_i32_0, %c0_i32_1 : i32, i32, i32, i32
  }
}

module attributes {stable_mosaic.version = 11 : i64} {
  func.func @linear_kernel(%arg0: i32, %arg1: memref<16x117xf32, #tpu.memory_space<vmem>>, %arg2: memref<117x32xf32, #tpu.memory_space<vmem>>, %arg3: memref<1x32xf32, #tpu.memory_space<vmem>>, %arg4: memref<16x32xf32, #tpu.memory_space<vmem>>) attributes {dimension_semantics = [#tpu.dimension_semantics<parallel>], iteration_bounds = array<i64: 1>, scalar_prefetch = 0 : i64, scratch_operands = 0 : i64, tpu.core_type = #tpu.core_type<tc>, window_params = [{transform_indices = @transform_0, window_bounds = array<i64: 16, 117>}, {pipeline_mode = #tpu.pipeline_mode<synchronous>, transform_indices = @transform_1, window_bounds = array<i64: 117, 32>}, {pipeline_mode = #tpu.pipeline_mode<synchronous>, transform_indices = @transform_2, window_bounds = array<i64: 1, 32>}, {transform_indices = @transform_3, window_bounds = array<i64: 16, 32>}]} {
    %c0 = arith.constant 0 : index
    %c0_0 = arith.constant 0 : index
    %0 = vector.load %arg1[%c0, %c0_0] : memref<16x117xf32, #tpu.memory_space<vmem>>, vector<16x117xf32>
    %c0_1 = arith.constant 0 : index
    %c0_2 = arith.constant 0 : index
    %1 = vector.load %arg2[%c0_1, %c0_2] : memref<117x32xf32, #tpu.memory_space<vmem>>, vector<117x32xf32>
    %cst = arith.constant dense<0.000000e+00> : vector<16x32xf32>
    %2 = tpu.matmul %0, %1, %cst {dimension_numbers = #tpu.dot_dimension_numbers<[1], [0], [0], [1], [0, 0, 1, 1], [], []>} : vector<16x117xf32>, vector<117x32xf32>, vector<16x32xf32> -> vector<16x32xf32>
    %c0_3 = arith.constant 0 : index
    %c0_4 = arith.constant 0 : index
    %3 = vector.load %arg3[%c0_3, %c0_4] : memref<1x32xf32, #tpu.memory_space<vmem>>, vector<1x32xf32>
    %4 = vector.broadcast %3 : vector<1x32xf32> to vector<16x32xf32>
    %5 = arith.addf %2, %4 : vector<16x32xf32>
    %c0_5 = arith.constant 0 : index
    %c0_6 = arith.constant 0 : index
    %6 = vector.load %arg4[%c0_5, %c0_6] : memref<16x32xf32, #tpu.memory_space<vmem>>, vector<16x32xf32>
    tpu.vector_store %arg4[%c0_5, %c0_6], %5 {strides = array<i32>} : memref<16x32xf32, #tpu.memory_space<vmem>>, vector<16x32xf32>,
    return
  }
  func.func @transform_0(%arg0: i32) -> (i32, i32) {
    %c0_i32 = arith.constant 0 : i32
    %c0_i32_0 = arith.constant 0 : i32
    return %arg0, %c0_i32 : i32, i32
  }
  func.func @transform_1(%arg0: i32) -> (i32, i32) {
    %c0_i32 = arith.constant 0 : i32
    %c0_i32_0 = arith.constant 0 : i32
    %c0_i32_1 = arith.constant 0 : i32
    return %c0_i32, %c0_i32_0 : i32, i32
  }
  func.func @transform_2(%arg0: i32) -> (i32, i32) {
    %c0_i32 = arith.constant 0 : i32
    %c0_i32_0 = arith.constant 0 : i32
    %c0_i32_1 = arith.constant 0 : i32
    return %c0_i32, %c0_i32_0 : i32, i32
  }
  func.func @transform_3(%arg0: i32) -> (i32, i32) {
    %c0_i32 = arith.constant 0 : i32
    %c0_i32_0 = arith.constant 0 : i32
    return %arg0, %c0_i32 : i32, i32
  }
}

</mosaic_0001>

<bundles_post_ra>
// kernel: model_forward.3
= control target key start
LH: loop header
LB: loop body
LE: loop exit
PB: predicated region body
PF: predicated region fallthrough
CT: control target
= control target key end

     0   :  { %vm45_vm0 = vcmask 1044480   ;;  %vm38_vm1 = vcmask 957440   ;;  %vm124_vm2 = vcmask 261120   ;;  %s267_s1 = inlined_call_operand.vmem [shape: f32[117,32], index: 1, kind: input, shape index: {}]   ;;  %s268_s0 = inlined_call_operand.vmem [shape: f32[16,117], index: 0, kind: input, shape index: {}]   ;;  %s269_s2 = inlined_call_operand.vmem [shape: f32[1,32], index: 2, kind: input, shape index: {}]   ;;  %s270_s3 = inlined_call_operand.vmem [shape: f32[16,32], index: 3, kind: output, shape index: {}]  }
   0x1   :  { %v30_v0 = vld [vmem:[%s267_s1 + $0x70] sm:$0x1f]  ;;  %v29_v1 = vld [vmem:[%s267_s1 + $0x68] sm:$0xff]  ;;  %v28_v2 = vld [vmem:[%s267_s1 + $0x60] sm:$0xff] }
   0x2   :  { %152 = vmatprep.subr.msk.mxu0 %vm45_vm0, %v30_v0  ;;  %v27_v3 = vld [vmem:[%s267_s1 + $0x58] sm:$0xff]  ;;  %v14_v4 = vld [vmem:[%s268_s0] sm:$0xff]  ;;  %v26_v5 = vld [vmem:[%s267_s1 + $0x50] sm:$0xff] }
   0x3   :  { %153 = vmatpush3.msk.msra.mxu0 %vm45_vm0, %v30_v0  ;;  %182 = vmatprep.mubr.msk.f32.mxu0 %vm38_vm1, %v14_v4  ;;  %v25_v6 = vld [vmem:[%s267_s1 + $0x48] sm:$0xff]  ;;  %v24_v7 = vld [vmem:[%s267_s1 + $0x40] sm:$0xff]  ;;  %v23_v8 = vld [vmem:[%s267_s1 + $0x38] sm:$0xff] }
   0x4   :  { %154 = vmatprep.subr.mxu0 %v29_v1  ;;  %v22_v9 = vld [vmem:[%s267_s1 + $0x30] sm:$0xff]  ;;  %v21_v10 = vld [vmem:[%s267_s1 + $0x28] sm:$0xff]  ;;  %v20_v11 = vld [vmem:[%s267_s1 + $0x20] sm:$0xff] }
   0x5   :  { %155 = vmatpush3.msra.mxu0 %v29_v1  ;;  %v19_v12 = vld [vmem:[%s267_s1 + $0x18] sm:$0xff]  ;;  %v18_v13 = vld [vmem:[%s267_s1 + $0x10] sm:$0xff]  ;;  %v17_v14 = vld [vmem:[%s267_s1 + $0x8] sm:$0xff] }
   0x6   :  { %156 = vmatprep.subr.mxu0 %v28_v2  ;;  %v16_v15 = vld [vmem:[%s267_s1] sm:$0xff]  ;;  %v15_v16 = vld [vmem:[%s268_s0 + $0x8] sm:$0xff] }
   0x7   :  { %157 = vmatpush3.msra.mxu0 %v28_v2  ;;  %v131_v17 = vld [vmem:[%s269_s2] ss:$0 sm:$0xff] }
   0x8   :  { %158 = vmatprep.subr.mxu0 %v27_v3 }
   0x9   :  { %159 = vmatpush3.msra.mxu0 %v27_v3 }
   0xa   :  { %160 = vmatprep.subr.mxu0 %v26_v5 }
   0xb   :  { %161 = vmatpush3.msra.mxu0 %v26_v5 }
   0xc   :  { %162 = vmatprep.subr.mxu0 %v25_v6 }
   0xd   :  { %163 = vmatpush3.msra.mxu0 %v25_v6 }
   0xe   :  { %164 = vmatprep.subr.mxu0 %v24_v7 }
   0xf   :  { %165 = vmatpush3.msra.mxu0 %v24_v7 }
  0x10   :  { %166 = vmatprep.subr.mxu0 %v23_v8 }
  0x11   :  { %167 = vmatpush3.msra.mxu0 %v23_v8 }
  0x12   :  { %168 = vmatprep.subr.mxu0 %v22_v9 }
  0x13   :  { %169 = vmatpush3.msra.mxu0 %v22_v9 }
  0x14   :  { %170 = vmatprep.subr.mxu0 %v21_v10 }
  0x15   :  { %171 = vmatpush3.msra.mxu0 %v21_v10 }
  0x16   :  { %172 = vmatprep.subr.mxu0 %v20_v11 }
  0x17   :  { %173 = vmatpush3.msra.mxu0 %v20_v11 }
  0x18   :  { %174 = vmatprep.subr.mxu0 %v19_v12 }
  0x19   :  { %175 = vmatpush3.msra.mxu0 %v19_v12 }
  0x1a   :  { %176 = vmatprep.subr.mxu0 %v18_v13 }
  0x1b   :  { %177 = vmatpush3.msra.mxu0 %v18_v13 }
  0x1c   :  { %178 = vmatprep.subr.mxu0 %v17_v14 }
  0x1d   :  { %179 = vmatpush3.msra.mxu0 %v17_v14 }
  0x1e   :  { %180 = vmatprep.subr.mxu0 %v16_v15 }
  0x1f   :  { %181 = vmatpush3.msra.mxu0 %v16_v15 }
  0x20   :  { %183 = vmatmul.mubr.msk.f32.vlgmr.msra.gmra.mxu0 %vm38_vm1, %v15_v16 }
  0xe0   :  { %v184_v18 = vpop.f32.mrf.mxu0 }
  0xe1   :  { %v121_v19 = vadd.f32 %v184_v18, %v131_v17 }
  0xe2   :  { %v115_v20 = vpop.f32.mrf.mxu0 }
  0xe3   :  { %126 = vst.msk [vmem:[%s270_s3 + $0x8] sm:$0xff] %vm124_vm2, %v121_v19  ;;  %v116_v21 = vadd.f32 %v131_v17, %v115_v20 }
  0xe5   :  { %125 = vst.msk [vmem:[%s270_s3] sm:$0xff] %vm124_vm2, %v116_v21 }

// kernel: model_forward.5
= control target key start
LH: loop header
LB: loop body
LE: loop exit
PB: predicated region body
PF: predicated region fallthrough
CT: control target
= control target key end

     0   :  { %9 = vsyncpa [#allocation3], 0  ;;  %s967_s0 = inlined_call_operand.vmem [shape: f32[2,8,4,8], index: 0, kind: input, shape index: {}]   ;;  %s968_s1 = inlined_call_operand.vmem [shape: f32[2,4,1,8], index: 1, kind: input, shape index: {}]   ;;  %s969_s2 = inlined_call_operand.vmem [shape: f32[2,4,8,1], index: 2, kind: input, shape index: {}]   ;;  %s970_s3 = inlined_call_operand.vmem [shape: f32[2,4,1,1], index: 3, kind: input, shape index: {}]   ;;  %s971_s4 = inlined_call_operand.hbm [shape: f32[2,4,8,8], index: 4, kind: output, shape index: {}]  }
   0x1   :  { %11 = vsyncpa [#allocation3 + $0x1], 0  ;;  %s737_s15 = smov 0   ;;  %s739_s16 = smov 0  }
   0x2   :  { %s741_s17 = smov 0   ;;  %s743_s18 = smov 0  }
   0x3 LB: > { %s758_s19 = sadd.s32 4294967295, %s706_s18   ;;  %s560_s20 = sadd.s32 4294967294, %s706_s18   ;;  %s706_s18 = sphi %s743_s18, %s977_s18   ;;  %s702_s17 = sphi %s741_s17, %s976_s17   ;;  %s698_s16 = sphi %s739_s16, %s975_s16   ;;  %s694_s15 = sphi %s737_s15, %s974_s15  }
   0x4   : > { %s762_s21 = sadd.s32 1, %s706_s18   ;;  %s128_s22 = sadd.s32 1, %s702_s17 }
   0x5   : > { %s125_s23 = ssub.s32 %s706_s18, %s762_s21  ;;  %p138_p0 = scmp.ne.s32.totalorder %s702_s17, %s698_s16 }
   0x6   : > { %p126_p1 = scmp.eq.s32.totalorder %s125_s23, 0  ;;  %p139_p2 = scmp.eq.s32.totalorder %s758_s19, 1 }
   0x7   : > { %p144_p3 = scmp.ne.s32.totalorder %s698_s16, %s694_s15  ;;  %p145_p4 = scmp.eq.s32.totalorder %s560_s20, 1 }
   0x8   : > { %s773_s24 = scalar_select %p126_p1, %s702_s17, %s128_s22  }
   0x9   : > { %p775_p5 = por %p139_p2, %p138_p0  ;;  %p779_p6 = por %p145_p4, %p144_p3 }
   0xa   : > { %p563_p7 = scmp.ge.s32.totalorder %s706_s18, 1  ;;  %p193_p8 = scmp.lt.s32.totalorder %s706_s18, 3 }
   0xc   : > { %p194_p9 = pnand %p563_p7, %p193_p8 }
   0xd   : > { %p232_p10 = scmp.lt.s32.totalorder (!%p194_p9), %s758_s19, 1  ;;  %s708_s10 = smov (!%p194_p9), 1  }
   0xe   : > { %197 = sbr.rel (%p194_p9) target bundleno = 175 (0xaf), region = 36  ;;  %s229_s11 = sand.u32 (!%p194_p9), 1, %s698_s16  }
   0xf   : > { %s564_s12 = sshll.u32 (!%p194_p9), %s229_s11, 5 }
  0x10   : > { %s877_s22 = scalar_lea.vmem (!%p194_p9), [#allocation2], %s564_s12 }
  0x13   : > { %s787_s27 = scalar_select %p232_p10, %s758_s19, 1  ;;  %vm265_vm0 = vcmask 1041409   ;;  %vm268_vm1 = vcmask 1042434   ;;  %vm271_vm2 = vcmask 1043459   ;;  %vm274_vm3 = vcmask 1044484  }
  0x14   : > { %vm277_vm4 = vcmask 1045509   ;;  %vm280_vm5 = vcmask 1046534   ;;  %vm296_vm6 = vcmask 57352   ;;  %vm302_vm7 = vcmask 0  }
  0x15   : > { %s567_s28 = sshll.u32 %s787_s27, 2  ;;  %s601_s29 = sshll.u32 %s787_s27, 5  ;;  %vm285_vm8 = vcmask 63496   ;;  %vm299_vm9 = vcmask 6144  }
  0x16   : > { %s796_s6 = scalar_lea.vmem %s968_s1, %s567_s28  ;;  %s804_s9 = scalar_lea.vmem %s967_s0, %s601_s29 }
  0x17   : > { %v574_v0 = vld [vmem:[%s796_s6 + $0x1] ss:$0 sm:$0xff]  ;;  %v571_v1 = vld [vmem:[%s796_s6] ss:$0 sm:$0xff]  ;;  %v582_v2 = vld [vmem:[%s796_s6 + $0x2] ss:$0 sm:$0xff]  ;;  %s249_s20 = scalar_lea.vmem %s970_s3, %s567_s28  ;;  %s245_s30 = scalar_lea.vmem %s969_s2, %s601_s29 }
  0x18   : > { %342 = vrot.lane.b32.xlu1 %v574_v0, %s708_s10  ;;  %293 = vrot.lane.b32.xlu0 %v571_v1, %s708_s10  ;;  %v250_v3 = vld [vmem:[%s804_s9] sm:$0x1]  ;;  %v251_v4 = vld [vmem:[%s804_s9 + $0x4] sm:$0x1]  ;;  %s603_s27 = sshll.u32 %s758_s19, 9  ;;  %s462_s29 = sshll.u32 %s877_s22, 4  ;;  %s919_s29 = int_to_ptr.vmem [resolvable:$true] %s462_s29 }
  0x19   : > { %v252_v5 = vld [vmem:[%s804_s9 + $0x8] sm:$0x1]  ;;  %v253_v6 = vld [vmem:[%s804_s9 + $0xc] sm:$0x1]  ;;  %v254_v7 = vld [vmem:[%s804_s9 + $0x10] sm:$0x1]  ;;  %s917_s7 = scalar_lea.hbm %s971_s4, %s603_s27 }
  0x1a   : > { %v255_v8 = vld [vmem:[%s804_s9 + $0x14] sm:$0x1]  ;;  %v256_v9 = vld [vmem:[%s804_s9 + $0x18] sm:$0x1]  ;;  %v264_v10 = vrot.slane %v251_v4, 7  ;;  %v267_v11 = vrot.slane %v252_v5, 6 }
  0x1b   : > { %v270_v12 = vrot.slane %v253_v6, 5  ;;  %v273_v13 = vrot.slane %v254_v7, 4  ;;  %v276_v14 = vrot.slane %v255_v8, 3  ;;  %v279_v15 = vrot.slane %v256_v9, 2  ;;  %v304_v16 = vld [vmem:[%s804_s9 + $0x1] sm:$0x1] }
  0x1c   : > { %390 = vrot.lane.b32.xlu1 %v582_v2, %s708_s10  ;;  %v266_v17 = vsel %vm265_vm0, %v264_v10, %v250_v3  ;;  %v305_v18 = vld [vmem:[%s804_s9 + $0x5] sm:$0x1]  ;;  %v306_v19 = vld [vmem:[%s804_s9 + $0x9] sm:$0x1]  ;;  %v307_v20 = vld [vmem:[%s804_s9 + $0xd] sm:$0x1] }
  0x1d   : > { %v269_v21 = vsel %vm268_vm1, %v267_v11, %v266_v17  ;;  %v308_v22 = vld [vmem:[%s804_s9 + $0x11] sm:$0x1]  ;;  %v309_v23 = vld [vmem:[%s804_s9 + $0x15] sm:$0x1]  ;;  %v310_v24 = vld [vmem:[%s804_s9 + $0x19] sm:$0x1] }
  0x1e   : > { %v272_v25 = vsel %vm271_vm2, %v270_v12, %v269_v21  ;;  %v318_v26 = vrot.slane %v305_v18, 7  ;;  %v320_v27 = vrot.slane %v306_v19, 6  ;;  %v322_v28 = vrot.slane %v307_v20, 5  ;;  %v352_v29 = vld [vmem:[%s804_s9 + $0x2] sm:$0x1]  ;;  %s927_s19 = scalar_lea.sflag [#allocation3], %s229_s11 }
  0x1f   : > { %v275_v30 = vsel %vm274_vm3, %v273_v13, %v272_v25  ;;  %v324_v31 = vrot.slane %v308_v22, 4  ;;  %v326_v32 = vrot.slane %v309_v23, 3  ;;  %v328_v33 = vrot.slane %v310_v24, 2  ;;  %v353_v34 = vld [vmem:[%s804_s9 + $0x6] sm:$0x1]  ;;  %s646_s8 = scalar_lea.vmem %s919_s29, 512 }
  0x20   : > { %v278_v35 = vsel %vm277_vm4, %v276_v14, %v275_v30  ;;  %v319_v36 = vsel %vm265_vm0, %v318_v26, %v304_v16  ;;  %v354_v37 = vld [vmem:[%s804_s9 + $0xa] sm:$0x1]  ;;  %v355_v38 = vld [vmem:[%s804_s9 + $0xe] sm:$0x1]  ;;  %v356_v39 = vld [vmem:[%s804_s9 + $0x12] sm:$0x1]  ;;  %p647_p11 = scmp.ne.s32.totalorder %s919_s29, %s646_s8 }
  0x21   : > { %v281_v40 = vsel %vm280_vm5, %v279_v15, %v278_v35  ;;  %v321_v41 = vsel %vm268_vm1, %v320_v27, %v319_v36  ;;  %v357_v42 = vld [vmem:[%s804_s9 + $0x16] sm:$0x1]  ;;  %v358_v43 = vld [vmem:[%s804_s9 + $0x1a] sm:$0x1]  ;;  %v366_v44 = vrot.slane %v353_v34, 7  ;;  %v368_v45 = vrot.slane %v354_v37, 6 }
  0x22   : > { %282 = vrot.lane.b32.xlu0 %v281_v40, %s708_s10  ;;  %v323_v46 = vsel %vm271_vm2, %v322_v28, %v321_v41  ;;  %v370_v47 = vrot.slane %v355_v38, 5  ;;  %v372_v48 = vrot.slane %v356_v39, 4  ;;  %v374_v51 = vrot.slane %v357_v42, 3  ;;  %v400_v53 = vld [vmem:[%s804_s9 + $0x3] sm:$0x1]  ;;  %p648_p12 = pnand %p647_p11, %p775_p5 }
  0x23   : > { %v325_v49 = vsel %vm274_vm3, %v324_v31, %v323_v46  ;;  %v367_v50 = vsel %vm265_vm0, %v366_v44, %v352_v29  ;;  %v376_v52 = vrot.slane %v358_v43, 2  ;;  %v401_v54 = vld [vmem:[%s804_s9 + $0x7] sm:$0x1]  ;;  %v402_v57 = vld [vmem:[%s804_s9 + $0xb] sm:$0x1] }
  0x24   : > { %v327_v55 = vsel %vm277_vm4, %v326_v32, %v325_v49  ;;  %v369_v56 = vsel %vm268_vm1, %v368_v45, %v367_v50  ;;  %v403_v58 = vld [vmem:[%s804_s9 + $0xf] sm:$0x1]  ;;  %v404_v59 = vld [vmem:[%s804_s9 + $0x13] sm:$0x1]  ;;  %v405_v62 = vld [vmem:[%s804_s9 + $0x17] sm:$0x1]  ;;  %p649_p13 = pneg %p648_p12 }
  0x25   : > { %v329_v60 = vsel %vm280_vm5, %v328_v33, %v327_v55  ;;  %v371_v61 = vsel %vm271_vm2, %v370_v47, %v369_v56  ;;  %v406_v63 = vld [vmem:[%s804_s9 + $0x1b] sm:$0x1]  ;;  %v414_v0 = vrot.slane %v401_v54, 7  ;;  %v416_v1 = vrot.slane %v402_v57, 6  ;;  %v590_v6 = vld [vmem:[%s796_s6 + $0x3] ss:$0 sm:$0xff] }
  0x26   : > { %330 = vrot.lane.b32.xlu1 %v329_v60, %s708_s10  ;;  %v373_v2 = vsel %vm274_vm3, %v372_v48, %v371_v61  ;;  %v418_v3 = vrot.slane %v403_v58, 5  ;;  %v420_v4 = vrot.slane %v404_v59, 4  ;;  %v422_v8 = vrot.slane %v405_v62, 3  ;;  %v578_v16 = vld [vmem:[%s249_s20 + $0x1] sm:$0x1]  ;;  %s709_s9 = smov [#allocation2]  }
  0x27   : > { %v375_v5 = vsel %vm277_vm4, %v374_v51, %v373_v2  ;;  %v415_v7 = vsel %vm265_vm0, %v414_v0, %v400_v53  ;;  %v424_v11 = vrot.slane %v406_v63, 2  ;;  %v301_v17 = vld [vmem:[%s249_s20] sm:$0x1]  ;;  %v586_v20 = vld [vmem:[%s249_s20 + $0x2] sm:$0x1] }
  0x28   : > { %v377_v9 = vsel %vm280_vm5, %v376_v52, %v375_v5  ;;  %v417_v10 = vsel %vm268_vm1, %v416_v1, %v415_v7  ;;  %v298_v22 = vld [vmem:[%s245_s30] sm:$0x7f]  ;;  %v576_v24 = vld [vmem:[%s245_s30 + $0x8] sm:$0x7f]  ;;  %v584_v26 = vld [vmem:[%s245_s30 + $0x10] sm:$0x7f] }
  0x29   : > { %378 = vrot.lane.b32.xlu0 %v377_v9, %s708_s10  ;;  %v419_v12 = vsel %vm271_vm2, %v418_v3, %v417_v10  ;;  %v594_v28 = vld [vmem:[%s249_s20 + $0x3] sm:$0x1]  ;;  %v592_v30 = vld [vmem:[%s245_s30 + $0x18] sm:$0x7f] }
  0x2a   : > { %438 = vrot.lane.b32.xlu1 %v590_v6, %s708_s10  ;;  %v421_v13 = vsel %vm274_vm3, %v420_v4, %v419_v12 }
  0x2b   : > { %v423_v14 = vsel %vm277_vm4, %v422_v8, %v421_v13 }
  0x2c   : > { %v425_v15 = vsel %vm280_vm5, %v424_v11, %v423_v14 }
  0x2d   : > { %426 = vrot.lane.b32.xlu0 %v425_v15, %s708_s10  ;;  %s650_s10 = sshll.u32 %s709_s9, 4  ;;  %s651_s10 = int_to_ptr.vmem [resolvable:$false] %s650_s10 }
  0x2e   : > { %s652_s12 = scalar_lea.vmem %s651_s10, 1024  ;;  %p653_p0 = scmp.lt.s32.totalorder %s919_s29, %s651_s10 }
  0x2f   : > { %p654_p1 = scmp.lt.s32.totalorder %s652_s12, %s646_s8 }
  0x31   : > { %p655_p2 = por %p654_p1, %p653_p0 }
  0x33   : > { %p656_p3 = pnand %p655_p2, %p649_p13 }
  0x8a   : > { %v343_v18 = vpop.permute.xlu1 %342  ;;  %v294_v19 = vpop.permute.xlu0 %293 }
  0x8b   : > { %575 = vst.msk [vmem:[%s877_s22 + $0x8] sm:$0x1] %vm296_vm6, %v343_v18  ;;  %297 = vst.msk [vmem:[%s877_s22] sm:$0x1] %vm296_vm6, %v294_v19 }
  0x8c   : > { %579 = vst.msk [vmem:[%s877_s22 + $0x8] sm:$0x1] %vm302_vm7, %v578_v16  ;;  %303 = vst.msk [vmem:[%s877_s22] sm:$0x1] %vm302_vm7, %v301_v17 }
  0x8e   : > { %v391_v21 = vpop.permute.xlu1 %390 }
  0x8f   : > { %583 = vst.msk [vmem:[%s877_s22 + $0x10] sm:$0x1] %vm296_vm6, %v391_v21 }
  0x90   : > { %587 = vst.msk [vmem:[%s877_s22 + $0x10] sm:$0x1] %vm302_vm7, %v586_v20 }
  0x94   : > { %v283_v23 = vpop.permute.xlu0 %282 }
  0x95   : > { %286 = vst.msk [vmem:[%s877_s22 + $0x1] sm:$0x7f] %vm285_vm8, %v283_v23 }
  0x96   : > { %300 = vst.msk [vmem:[%s877_s22 + $0x1] sm:$0x7f] %vm299_vm9, %v298_v22 }
  0x98   : > { %v331_v25 = vpop.permute.xlu1 %330 }
  0x99   : > { %572 = vst.msk [vmem:[%s877_s22 + $0x9] sm:$0x7f] %vm285_vm8, %v331_v25 }
  0x9a   : > { %577 = vst.msk [vmem:[%s877_s22 + $0x9] sm:$0x7f] %vm299_vm9, %v576_v24 }
  0x9b   : > { %v379_v27 = vpop.permute.xlu0 %378 }
  0x9c   : > { %580 = vst.msk [vmem:[%s877_s22 + $0x11] sm:$0x7f] %vm285_vm8, %v379_v27  ;;  %v439_v29 = vpop.permute.xlu1 %438 }
  0x9d   : > { %585 = vst.msk [vmem:[%s877_s22 + $0x11] sm:$0x7f] %vm299_vm9, %v584_v26 }
  0x9e   : > { %591 = vst.msk [vmem:[%s877_s22 + $0x18] sm:$0x1] %vm296_vm6, %v439_v29 }
  0x9f   : > { %595 = vst.msk [vmem:[%s877_s22 + $0x18] sm:$0x1] %vm302_vm7, %v594_v28  ;;  %v427_v31 = vpop.permute.xlu0 %426 }
  0xa0   : > { %588 = vst.msk [vmem:[%s877_s22 + $0x19] sm:$0x7f] %vm285_vm8, %v427_v31 }
  0xa1   : > { %593 = vst.msk [vmem:[%s877_s22 + $0x19] sm:$0x7f] %vm299_vm9, %v592_v30 }
  0xa2   : > { %659 = shalt.err (!%p656_p3)
}
  0xa3   : > { %s660_s11 = scalar_lea.hbm %s917_s7, 512  ;;  %s664_s20 = scalar_lea.hbm %s971_s4, 1024 }
  0xa4   : > { %p661_p4 = scmp.ne.s32.totalorder %s917_s7, %s660_s11  ;;  %p665_p9 = scmp.lt.s32.totalorder %s917_s7, %s971_s4 }
  0xa5   : > { %p666_p10 = scmp.lt.s32.totalorder %s664_s20, %s660_s11 }
  0xa6   : > { %p662_p7 = pnand %p661_p4, %p775_p5 }
  0xa7   : > { %p667_p11 = por %p666_p10, %p665_p9 }
  0xa8   : > { %p663_p8 = pneg %p662_p7 }
  0xaa   : > { %p668_p12 = pnand %p667_p11, %p663_p8 }
  0xac   : > { %671 = shalt.err (!%p668_p12)
}
  0xad   : > { %s710_s28 = smov 128   ;;  %s711_s30 = smov 8  }
  0xae   : > { %604 = dma.vmem_to_hbm [thread:$0]  (%p775_p5), %s919_s29, 512, %s917_s7, %s927_s19, %s710_s28, %s710_s28, %s711_s30  }
  0xaf PF: > { %p610_p13 = scmp.ge.s32.totalorder %s706_s18, 2  ;;  %s477_s27 = sand.u32 1, %s694_s15  }
  0xb0   : > { %s478_s5 = scalar_lea.sflag [#allocation3], %s477_s27 }
  0xb1   : > { %p607_p0 = pnand %p610_p13, %p779_p6 }
  0xb3   : > { %p608_p1 = pneg %p607_p0 }
  0xb5   : > { %689 = dma.done.wait (%p608_p1), %s478_s5, 512  }
  0xb6   : > { %691 = vsyncadd (%p608_p1), %s478_s5, 4294966784  ;;  %p14_p2 = scmp.ge.s32.totalorder %s762_s21, 4   ;;  %s974_s15 = smov %s698_s16 }
  0xb7   : > { %s975_s16 = smov %s702_s17  ;;  %s976_s17 = smov %s773_s24 }
  0xb8   : > { %s977_s18 = smov %s762_s21  ;;  %16 = sbr.rel (!%p14_p2) target bundleno = 3 (0x3), region = 92 }
  0xbd   :  { %483 = vsyncpa [#allocation3], 1 }
  0xbe   :  { %485 = vsyncpa [#allocation3 + $0x1], 1 }

// kernel: model_forward.4
= control target key start
LH: loop header
LB: loop body
LE: loop exit
PB: predicated region body
PF: predicated region fallthrough
CT: control target
= control target key end

     0   :  { %13 = vsyncpa [#allocation3], 0  ;;  %s2067_s0 = inlined_call_operand.hbm [shape: f32[2,8,8,272], index: 0, kind: input, shape index: {}]   ;;  %s2068_s1 = inlined_call_operand.vmem [shape: f32[272,4], index: 1, kind: input, shape index: {}]   ;;  %s2069_s2 = inlined_call_operand.vmem [shape: f32[1,4], index: 2, kind: input, shape index: {}]   ;;  %s2070_s3 = inlined_call_operand.vmem [shape: f32[2,8,1,1], index: 3, kind: input, shape index: {}]   ;;  %s2071_s4 = inlined_call_operand.vmem [shape: f32[2,1,8], index: 4, kind: input, shape index: {}]   ;;  %s2072_s5 = inlined_call_operand.vmem [shape: f32[2,8,4,8], index: 5, kind: output, shape index: {0}]   ;;  %s2073_s6 = inlined_call_operand.vmem [shape: f32[2,4,8], index: 6, kind: output, shape index: {1}]   ;;  %s2074_s7 = inlined_call_operand.vmem [shape: f32[2,4,1], index: 7, kind: output, shape index: {2}]  }
   0x1   :  { %15 = vsyncpa [#allocation3 + $0x1], 0  ;;  %s1706_s24 = smov 0   ;;  %s1708_s25 = smov 0  }
   0x2   :  { %s1710_s26 = smov 0   ;;  %s1712_s27 = smov 0  }
   0x3   :  { %s1714_s28 = smov 0   ;;  %s1716_s29 = smov 0  }
   0x4 LB: > { %s1376_s30 = sadd.s32 4294967295, %s1659_s29   ;;  %s33_s8 = sadd.s32 1, %s1655_s28  ;;  %s1659_s29 = sphi %s1716_s29, %s21_s29   ;;  %s1655_s28 = sphi %s1714_s28, %s2081_s28   ;;  %s1651_s27 = sphi %s1712_s27, %s2080_s27   ;;  %s1647_s26 = sphi %s1710_s26, %s2079_s26   ;;  %s1643_s25 = sphi %s1708_s25, %s2078_s25   ;;  %s1639_s24 = sphi %s1706_s24, %s2077_s24  }
   0x5   : > { %p35_p0 = scmp.ge.s32.totalorder %s33_s8, 2  ;;  %s42_s9 = sadd.s32 1, %s1647_s26 }
   0x6   : > { %p49_p1 = scmp.ne.s32.totalorder %s1647_s26, %s1643_s25  ;;  %p50_p2 = scmp.eq.s32.totalorder %s1659_s29, 0 }
   0x7   : > { %s2083_s8 = smov (%p35_p0, %s33_s8), 0  ;;  %p55_p4 = scmp.ne.s32.totalorder %s1643_s25, %s1639_s24 }
   0x8   : > { %p51_p3 = por %p50_p2, %p49_p1  ;;  %s37_s10 = ssub.s32 %s1655_s28, %s2083_s8 }
   0x9   : > { %p56_p5 = scmp.eq.s32.totalorder %s1376_s30, 0  ;;  %p40_p6 = scmp.eq.s32.totalorder %s37_s10, 0 }
   0xa   : > { %p1524_p8 = scmp.lt.s32.totalorder %s1659_s29, 2  ;;  %s261_s13 = sand.u32 1, %s1647_s26  }
   0xb   : > { %p1745_p7 = por %p56_p5, %p55_p4  ;;  %s1514_s14 = smul.u32 3072, %s1655_s28 }
   0xc   : > { %s1751_s12 = scalar_select %p40_p6, %s1647_s26, %s42_s9  }
   0xd   : > { %s1513_s15 = smul.u32 192, %s261_s13  ;;  %s274_s18 = scalar_lea.hbm %s2067_s0, %s1514_s14 }
   0xe   : > { %p1758_p9 = pnand %p1524_p8, %p51_p3  ;;  %s262_s22 = scalar_lea.sflag [#allocation3], %s261_s13 }
   0xf   : > { %s265_s20 = scalar_lea.vmem [#allocation2], %s1513_s15  ;;  %s1661_s24 = smov [#allocation2]  }
  0x10   : > { %s275_s21 = sshll.u32 %s265_s20, 4  ;;  %p1583_p10 = pneg %p1758_p9  ;;  %s276_s21 = int_to_ptr.vmem [resolvable:$true] %s275_s21 }
  0x11   : > { %s1594_s23 = scalar_lea.vmem %s276_s21, 3072  ;;  %s1599_s30 = sshll.u32 %s1661_s24, 4  ;;  %s1600_s30 = int_to_ptr.vmem [resolvable:$false] %s1599_s30 }
  0x12   : > { %p1595_p11 = scmp.ne.s32.totalorder %s276_s21, %s1594_s23  ;;  %s1601_s9 = scalar_lea.vmem %s1600_s30, 6144 }
  0x13   : > { %p1602_p0 = scmp.lt.s32.totalorder %s276_s21, %s1600_s30  ;;  %p1603_p1 = scmp.lt.s32.totalorder %s1601_s9, %s1594_s23 }
  0x14   : > { %p1597_p12 = pnand %p1595_p11, %p1583_p10 }
  0x15   : > { %p1604_p2 = por %p1603_p1, %p1602_p0 }
  0x16   : > { %p1598_p13 = pneg %p1597_p12 }
  0x18   : > { %p1605_p3 = pnand %p1604_p2, %p1598_p13 }
  0x1a   : > { %1608 = shalt.err (!%p1605_p3)
}
  0x1b   : > { %s1662_s10 = smov 384   ;;  %s1663_s13 = smov 24  }
  0x1c   : > { %1523 = dma.hbm_to_vmem [thread:$0]  (!%p1758_p9), %s274_s18, 3072, %s276_s21, %s262_s22, %s1662_s10, %s1662_s10, %s1663_s13  }
  0x1d   : > { %p1381_p4 = scmp.ge.s32.totalorder %s1659_s29, 1  ;;  %p301_p5 = scmp.lt.s32.totalorder %s1659_s29, 3 }
  0x1f   : > { %p302_p6 = pnand %p1381_p4, %p301_p5 }
  0x20   : > { %s307_s14 = sand.u32 (!%p302_p6), 1, %s1643_s25  }
  0x21   : > { %305 = sbr.rel (%p302_p6) target bundleno = 590 (0x24e), region = 40  ;;  %s308_s16 = scalar_lea.sflag (!%p302_p6), [#allocation3], %s307_s14 }
  0x22   : > { %s1515_s15 = smul.u32 (!%p302_p6), 192, %s307_s14 }
  0x24   : > { %s1769_s17 = scalar_lea.vmem (!%p302_p6), [#allocation2], %s1515_s15 }
  0x26   : > { %1634 = dma.done.wait (%p1745_p7), %s308_s16, 3072  }
  0x27   : > { %1636 = vsyncadd (%p1745_p7), %s308_s16, 4294964224  ;;  %v1664_v0 = vmov 0   ;;  %v457_v1 = vld [vmem:[%s2068_s1 + $0xf8] sm:$0xff]  ;;  %v456_v3 = vld [vmem:[%s2068_s1 + $0xf0] sm:$0xff]  ;;  %p367_p7 = scmp.lt.s32.totalorder %s1651_s27, 1  ;;  %v992_v22 = vlaneseq  ;;  %vm467_vm2 = vcmask 130048  }
  0x28   : > { %1577 = vset.pattern.permute.xlu0 %v1664_v0  ;;  %1578 = vset.pattern.permute.xlu1 %v1664_v0  ;;  %v441_v2 = vld [vmem:[%s2068_s1 + $0x78] sm:$0xff]  ;;  %v440_v4 = vld [vmem:[%s2068_s1 + $0x70] sm:$0xff]  ;;  %v455_v5 = vld [vmem:[%s2068_s1 + $0xe8] sm:$0xff]  ;;  %vm1165_vm9 = vcmask 57344   ;;  %vm400_vm10 = vcmask 60416  }
  0x29   : > { %1399 = vmatprep.subr.mxu0 %v457_v1  ;;  %1481 = vmatprep.subr.mxu1 %v457_v1  ;;  %v439_v6 = vld [vmem:[%s2068_s1 + $0x68] sm:$0xff]  ;;  %v454_v7 = vld [vmem:[%s2068_s1 + $0xe0] sm:$0xff]  ;;  %v453_v9 = vld [vmem:[%s2068_s1 + $0xd8] sm:$0xff]  ;;  %s2085_s27 = smov (!%p367_p7, %s1651_s27), 1  ;;  %v993_v27 = vshrl.u32 %v992_v22, 7 }
  0x2a   : > { %1400 = vmatpush3.msra.mxu0 %v441_v2  ;;  %1497 = vmatpush3.msra.mxu1 %v441_v2  ;;  %v438_v8 = vld [vmem:[%s2068_s1 + $0x60] sm:$0xff]  ;;  %v437_v10 = vld [vmem:[%s2068_s1 + $0x58] sm:$0xff]  ;;  %v452_v11 = vld [vmem:[%s2068_s1 + $0xd0] sm:$0xff]  ;;  %s1382_s24 = sshll.u32 %s2085_s27, 3  ;;  %s377_s14 = scalar_lea.vmem %s2071_s4, %s2085_s27 }
  0x2b   : > { %1401 = vmatprep.subr.mxu0 %v456_v3  ;;  %1482 = vmatprep.subr.mxu1 %v456_v3  ;;  %v436_v12 = vld [vmem:[%s2068_s1 + $0x50] sm:$0xff]  ;;  %v451_v13 = vld [vmem:[%s2068_s1 + $0xc8] sm:$0xff]  ;;  %v450_v15 = vld [vmem:[%s2068_s1 + $0xc0] sm:$0xff]  ;;  %s1878_s22 = scalar_lea.vmem %s2070_s3, %s1382_s24  ;;  %v1880_v32 = vsub.s32 0, %v993_v27  ;;  %s1385_s19 = sshll.u32 %s2085_s27, 2 }
  0x2c   : > { %1402 = vmatpush3.msra.mxu0 %v440_v4  ;;  %1498 = vmatpush3.msra.mxu1 %v440_v4  ;;  %v435_v14 = vld [vmem:[%s2068_s1 + $0x48] sm:$0xff]  ;;  %v434_v16 = vld [vmem:[%s2068_s1 + $0x40] sm:$0xff]  ;;  %v449_v17 = vld [vmem:[%s2068_s1 + $0xb8] sm:$0xff]  ;;  %s1398_s23 = sshll.u32 %s2085_s27, 5  ;;  %s395_s15 = scalar_lea.vmem %s2074_s7, %s1385_s19 }
  0x2d   : > { %1403 = vmatprep.subr.mxu0 %v455_v5  ;;  %1483 = vmatprep.subr.mxu1 %v455_v5  ;;  %v433_v18 = vld [vmem:[%s2068_s1 + $0x38] sm:$0xff]  ;;  %v448_v19 = vld [vmem:[%s2068_s1 + $0xb0] sm:$0xff]  ;;  %v447_v21 = vld [vmem:[%s2068_s1 + $0xa8] sm:$0xff]  ;;  %s2001_s24 = scalar_lea.vmem %s2072_s5, %s1398_s23 }
  0x2e   : > { %1404 = vmatpush3.msra.mxu0 %v439_v6  ;;  %1499 = vmatpush3.msra.mxu1 %v439_v6  ;;  %v432_v20 = vld [vmem:[%s2068_s1 + $0x30] sm:$0xff]  ;;  %v431_v23 = vld [vmem:[%s2068_s1 + $0x28] sm:$0xff]  ;;  %v446_v24 = vld [vmem:[%s2068_s1 + $0xa0] sm:$0xff] }
  0x2f   : > { %1405 = vmatprep.subr.mxu0 %v454_v7  ;;  %1484 = vmatprep.subr.mxu1 %v454_v7  ;;  %v430_v25 = vld [vmem:[%s2068_s1 + $0x20] sm:$0xff]  ;;  %v445_v26 = vld [vmem:[%s2068_s1 + $0x98] sm:$0xff]  ;;  %v444_v29 = vld [vmem:[%s2068_s1 + $0x90] sm:$0xff] }
  0x30   : > { %1406 = vmatpush3.msra.mxu0 %v438_v8  ;;  %1500 = vmatpush3.msra.mxu1 %v438_v8  ;;  %v429_v28 = vld [vmem:[%s2068_s1 + $0x18] sm:$0xff]  ;;  %v428_v30 = vld [vmem:[%s2068_s1 + $0x10] sm:$0xff]  ;;  %v443_v31 = vld [vmem:[%s2068_s1 + $0x88] sm:$0xff] }
  0x31   : > { %1407 = vmatprep.subr.mxu0 %v453_v9  ;;  %1485 = vmatprep.subr.mxu1 %v453_v9  ;;  %v427_v33 = vld [vmem:[%s2068_s1 + $0x8] sm:$0xff]  ;;  %v1885_v34 = vld [vmem:[%s377_s14] sm:$0x1]  ;;  %v421_v40 = vld [vmem:[%s1769_s17 + $0x98] sm:$0xff] }
  0x32   : > { %1408 = vmatpush3.msra.mxu0 %v437_v10  ;;  %1501 = vmatpush3.msra.mxu1 %v437_v10  ;;  %v442_v35 = vld [vmem:[%s2068_s1 + $0x80] sm:$0xff]  ;;  %v1892_v36 = vrot.slane %v1885_v34, %v1880_v32  ;;  %v403_v39 = vld [vmem:[%s1769_s17 + $0x8] sm:$0xff]  ;;  %v420_v42 = vld [vmem:[%s1769_s17 + $0x90] sm:$0xff] }
  0x33   : > { %1409 = vmatprep.subr.mxu0 %v452_v11  ;;  %1486 = vmatprep.subr.mxu1 %v452_v11  ;;  %v426_v37 = vld [vmem:[%s2068_s1] sm:$0xff]  ;;  %v459_v43 = vld [vmem:[%s2068_s1 + $0x108] sm:$0xff]  ;;  %v424_v45 = vld [vmem:[%s1769_s17 + $0xb0] sm:$0xff] }
  0x34   : > { %1410 = vmatpush3.msra.mxu0 %v436_v12  ;;  %1502 = vmatpush3.msra.mxu1 %v436_v12  ;;  %v967_v38 = vld [vmem:[%s1878_s22] sm:$0x1]  ;;  %v968_v47 = vld [vmem:[%s1878_s22 + $0x1] sm:$0x1]  ;;  %v405_v50 = vld [vmem:[%s1769_s17 + $0x18] sm:$0xff] }
  0x35   : > { %1411 = vmatprep.subr.mxu0 %v451_v13  ;;  %1487 = vmatprep.subr.mxu1 %v451_v13  ;;  %vm976_vm0 = vcmp.gt.f32.partialorder %v967_v38, 0.0  ;;  %v402_v41 = vld [vmem:[%s1769_s17] sm:$0xff]  ;;  %v995_v46 = vrot.slane %v967_v38, %v1880_v32  ;;  %vm977_vm1 = vcmp.gt.f32.partialorder %v968_v47, 0.0  ;;  %v423_v51 = vld [vmem:[%s1769_s17 + $0xa8] sm:$0xff]  ;;  %v409_v52 = vld [vmem:[%s1769_s17 + $0x38] sm:$0xff]  ;;  %v999_v55 = vrot.slane %v968_v47, %v1880_v32 }
  0x36   : > { %1412 = vmatpush3.msra.mxu0 %v435_v14  ;;  %1503 = vmatpush3.msra.mxu1 %v435_v14  ;;  %v406_v44 = vld [vmem:[%s1769_s17 + $0x20] sm:$0xff]  ;;  %v1064_v48 = vsel %vm976_vm0, 1, %v1664_v0  ;;  %v404_v54 = vld [vmem:[%s1769_s17 + $0x10] sm:$0xff]  ;;  %v1065_v57 = vsel %vm977_vm1, 1, %v1664_v0  ;;  %v407_v59 = vld [vmem:[%s1769_s17 + $0x28] sm:$0xff] }
  0x37   : > { %1413 = vmatprep.subr.mxu0 %v450_v15  ;;  %1488 = vmatprep.subr.mxu1 %v450_v15  ;;  %v458_v49 = vld [vmem:[%s2068_s1 + $0x100] sm:$0xff]  ;;  %v1075_v53 = vrot.slane %v1064_v48, %v1880_v32  ;;  %v408_v58 = vld [vmem:[%s1769_s17 + $0x30] sm:$0xff]  ;;  %v1079_v62 = vrot.slane %v1065_v57, %v1880_v32  ;;  %v411_v3 = vld [vmem:[%s1769_s17 + $0x48] sm:$0xff] }
  0x38   : > { %1414 = vmatpush3.msra.mxu0 %v434_v16  ;;  %1504 = vmatpush3.msra.mxu1 %v434_v16  ;;  %v969_v56 = vld [vmem:[%s1878_s22 + $0x2] sm:$0x1]  ;;  %v412_v60 = vld [vmem:[%s1769_s17 + $0x50] sm:$0xff]  ;;  %v970_v1 = vld [vmem:[%s1878_s22 + $0x3] sm:$0x1] }
  0x39   : > { %1415 = vmatprep.subr.mxu0 %v449_v17  ;;  %1489 = vmatprep.subr.mxu1 %v449_v17  ;;  %vm978_vm3 = vcmp.gt.f32.partialorder %v969_v56, 0.0  ;;  %v410_v61 = vld [vmem:[%s1769_s17 + $0x40] sm:$0xff]  ;;  %v1003_v63 = vrot.slane %v969_v56, %v1880_v32  ;;  %vm979_vm4 = vcmp.gt.f32.partialorder %v970_v1, 0.0  ;;  %v413_v4 = vld [vmem:[%s1769_s17 + $0x58] sm:$0xff]  ;;  %v415_v5 = vld [vmem:[%s1769_s17 + $0x68] sm:$0xff]  ;;  %v1007_v8 = vrot.slane %v970_v1, %v1880_v32 }
  0x3a   : > { %1416 = vmatpush3.msra.mxu0 %v433_v18  ;;  %1505 = vmatpush3.msra.mxu1 %v433_v18  ;;  %v1066_v2 = vsel %vm978_vm3, 1, %v1664_v0  ;;  %v416_v6 = vld [vmem:[%s1769_s17 + $0x70] sm:$0xff]  ;;  %v971_v9 = vld [vmem:[%s1878_s22 + $0x4] sm:$0x1]  ;;  %v1067_v10 = vsel %vm979_vm4, 1, %v1664_v0  ;;  %v419_v12 = vld [vmem:[%s1769_s17 + $0x88] sm:$0xff] }
  0x3b   : > { %1417 = vmatprep.subr.mxu0 %v448_v19  ;;  %1490 = vmatprep.subr.mxu1 %v448_v19  ;;  %v1083_v7 = vrot.slane %v1066_v2, %v1880_v32  ;;  %vm980_vm5 = vcmp.gt.f32.partialorder %v971_v9, 0.0  ;;  %v414_v11 = vld [vmem:[%s1769_s17 + $0x60] sm:$0xff]  ;;  %v1087_v15 = vrot.slane %v1067_v10, %v1880_v32  ;;  %v1011_v16 = vrot.slane %v971_v9, %v1880_v32  ;;  %v417_v19 = vld [vmem:[%s1769_s17 + $0x78] sm:$0xff] }
  0x3c   : > { %1418 = vmatpush3.msra.mxu0 %v432_v20  ;;  %1506 = vmatpush3.msra.mxu1 %v432_v20  ;;  %v418_v13 = vld [vmem:[%s1769_s17 + $0x80] sm:$0xff]  ;;  %v1068_v18 = vsel %vm980_vm5, 1, %v1664_v0  ;;  %v425_v20 = vld [vmem:[%s1769_s17 + $0xb8] sm:$0xff]  ;;  %vm1193_vm3 = vcmask 3072  }
  0x3d   : > { %1419 = vmatprep.subr.mxu0 %v447_v21  ;;  %1491 = vmatprep.subr.mxu1 %v447_v21  ;;  %v422_v14 = vld [vmem:[%s1769_s17 + $0xa0] sm:$0xff]  ;;  %v1091_v21 = vrot.slane %v1068_v18, %v1880_v32 }
  0x3e   : > { %1420 = vmatpush3.msra.mxu0 %v431_v23  ;;  %1507 = vmatpush3.msra.mxu1 %v431_v23  ;;  %v972_v17 = vld [vmem:[%s1878_s22 + $0x5] sm:$0x1]  ;;  %v973_v23 = vld [vmem:[%s1878_s22 + $0x6] sm:$0x1]  ;;  %v974_v27 = vld [vmem:[%s1878_s22 + $0x7] sm:$0x1]  ;;  %s1993_s22 = scalar_lea.vmem %s2073_s6, %s1385_s19 }
  0x3f   : > { %1421 = vmatprep.subr.mxu0 %v446_v24  ;;  %1492 = vmatprep.subr.mxu1 %v446_v24  ;;  %vm981_vm6 = vcmp.gt.f32.partialorder %v972_v17, 0.0  ;;  %v1015_v22 = vrot.slane %v972_v17, %v1880_v32  ;;  %vm982_vm7 = vcmp.gt.f32.partialorder %v973_v23, 0.0  ;;  %vm983_vm8 = vcmp.gt.f32.partialorder %v974_v27, 0.0 }
  0x40   : > { %1422 = vmatpush3.msra.mxu0 %v430_v25  ;;  %1508 = vmatpush3.msra.mxu1 %v430_v25  ;;  %v1069_v24 = vsel %vm981_vm6, 1, %v1664_v0 }
  0x41   : > { %1423 = vmatprep.subr.mxu0 %v445_v26  ;;  %1493 = vmatprep.subr.mxu1 %v445_v26  ;;  %v1095_v25 = vrot.slane %v1069_v24, %v1880_v32  ;;  %v1019_v26 = vrot.slane %v973_v23, %v1880_v32 }
  0x42   : > { %1424 = vmatpush3.msra.mxu0 %v429_v28  ;;  %1509 = vmatpush3.msra.mxu1 %v429_v28  ;;  %v1070_v28 = vsel %vm982_vm7, 1, %v1664_v0 }
  0x43   : > { %1425 = vmatprep.subr.mxu0 %v444_v29  ;;  %1494 = vmatprep.subr.mxu1 %v444_v29  ;;  %v1099_v29 = vrot.slane %v1070_v28, %v1880_v32 }
  0x44   : > { %1426 = vmatpush3.msra.mxu0 %v428_v30  ;;  %1510 = vmatpush3.msra.mxu1 %v428_v30  ;;  %v1023_v30 = vrot.slane %v974_v27, %v1880_v32 }
  0x45   : > { %1427 = vmatprep.subr.mxu0 %v443_v31  ;;  %1495 = vmatprep.subr.mxu1 %v443_v31  ;;  %v1071_v31 = vsel %vm983_vm8, 1, %v1664_v0 }
  0x46   : > { %1428 = vmatpush3.msra.mxu0 %v427_v33  ;;  %1511 = vmatpush3.msra.mxu1 %v427_v33  ;;  %v1103_v33 = vrot.slane %v1071_v31, %v1880_v32 }
  0x47   : > { %1429 = vmatprep.subr.mxu0 %v442_v35  ;;  %1496 = vmatprep.subr.mxu1 %v442_v35  ;;  %v1166_v35 = vsel %vm1165_vm9, %v1885_v34, 0.0 }
  0x48   : > { %1430 = vmatpush3.msra.mxu0 %v426_v37  ;;  %1512 = vmatpush3.msra.mxu1 %v426_v37 }
  0x49   : > { %556 = vmatprep.mubr.f32.mxu0 %v403_v39  ;;  %586 = vmatprep.mubr.f32.mxu1 %v421_v40 }
  0x4a   : > { %557 = vmatmul.mubr.f32.vlgmr.msra.gmra.mxu0 %v402_v41  ;;  %587 = vmatmul.mubr.f32.vlgmr.msra.gmra.mxu1 %v420_v42 }
  0x4b   : > { %1465 = vmatprep.subr.mxu1 %v459_v43  ;;  %561 = vmatprep.mubr.f32.mxu0 %v406_v44 }
  0x4c   : > { %1466 = vmatpush3.msra.mxu1 %v459_v43  ;;  %591 = vmatprep.mubr.f32.mxu1 %v424_v45 }
  0x4d   : > { %1467 = vmatprep.subr.mxu1 %v458_v49  ;;  %1025 = vperm.xlu0 %1577, %v995_v46  }
  0x4e   : > { %562 = vmatmul.mubr.f32.gmra.mxu0 %v405_v50  ;;  %592 = vmatmul.mubr.f32.gmra.mxu1 %v423_v51  ;;  %v1387_v51 = vld [vmem:[%s2069_s2] ss:$0 sm:$0xff] }
  0x4f   : > { %1468 = vmatpush3.msra.mxu1 %v458_v49  ;;  %566 = vmatprep.mubr.f32.mxu0 %v409_v52 }
  0x50   : > { %1469 = vmatprep.mubr.msk.f32.mxu1 %vm467_vm2, %v404_v54  ;;  %1105 = vperm.xlu1 %1578, %v1075_v53  }
  0x51   : > { %1029 = vperm.xlu0 %1577, %v999_v55  }
  0x52   : > { %567 = vmatmul.mubr.f32.gmra.mxu0 %v408_v58  ;;  %1470 = vmatmul.mubr.msk.f32.vlgmr.msra.gmra.mxu1 %vm467_vm2, %v407_v59 }
  0x53   : > { %571 = vmatprep.mubr.f32.mxu0 %v412_v60  ;;  %1472 = vmatprep.mubr.msk.f32.mxu1 %vm467_vm2, %v410_v61 }
  0x54   : > { %1108 = vperm.xlu1 %1578, %v1079_v62  }
  0x55   : > { %1033 = vperm.xlu0 %1577, %v1003_v63  }
  0x56   : > { %572 = vmatmul.mubr.f32.gmra.mxu0 %v411_v3  ;;  %1473 = vmatmul.mubr.msk.f32.gmra.mxu1 %vm467_vm2, %v413_v4 }
  0x57   : > { %576 = vmatprep.mubr.f32.mxu0 %v415_v5  ;;  %1475 = vmatprep.mubr.msk.f32.mxu1 %vm467_vm2, %v416_v6 }
  0x58   : > { %1111 = vperm.xlu1 %1578, %v1083_v7  }
  0x59   : > { %1037 = vperm.xlu0 %1577, %v1007_v8  }
  0x5a   : > { %577 = vmatmul.mubr.f32.gmra.mxu0 %v414_v11  ;;  %1476 = vmatmul.mubr.msk.f32.gmra.mxu1 %vm467_vm2, %v419_v12 }
  0x5b   : > { %581 = vmatprep.mubr.f32.mxu0 %v418_v13  ;;  %1478 = vmatprep.mubr.msk.f32.mxu1 %vm467_vm2, %v422_v14 }
  0x5c   : > { %1114 = vperm.xlu1 %1578, %v1087_v15  }
  0x5d   : > { %1041 = vperm.xlu0 %1577, %v1011_v16  }
  0x5e   : > { %582 = vmatmul.mubr.f32.gmra.mxu0 %v417_v19  ;;  %1479 = vmatmul.mubr.msk.f32.gmra.mxu1 %vm467_vm2, %v425_v20 }
  0x60   : > { %1117 = vperm.xlu1 %1578, %v1091_v21  }
  0x61   : > { %1045 = vperm.xlu0 %1577, %v1015_v22  }
  0x64   : > { %1120 = vperm.xlu1 %1578, %v1095_v25  }
  0x65   : > { %1049 = vperm.xlu0 %1577, %v1019_v26  }
  0x68   : > { %1123 = vperm.xlu1 %1578, %v1099_v29  }
  0x69   : > { %1053 = vperm.xlu0 %1577, %v1023_v30  }
  0x6c   : > { %1126 = vperm.xlu1 %1578, %v1103_v33  }
  0x88   : > { %1167 = vadd.xlane.f32.xlu0 %v1166_v35  ;;  %v1665_v35 = vmov 0.0  }
  0x89   : > { %401 = vst.msk [vmem:[%s1993_s22] sm:$0xf] %vm400_vm10, %v1665_v35 }
  0xc8   : > { %v1968_v37 = vpop.permute.xlu0 %1025 }
  0xcc   : > { %v1970_v38 = vpop.permute.xlu0 %1029 }
  0xd0   : > { %v1972_v39 = vpop.permute.xlu0 %1033 }
  0xd4   : > { %v1974_v40 = vpop.permute.xlu0 %1037 }
  0xd8   : > { %v1976_v41 = vpop.permute.xlu0 %1041 }
  0xdc   : > { %v1978_v0 = vpop.permute.xlu0 %1045 }
  0xe0   : > { %v1980_v42 = vpop.permute.xlu0 %1049 }
  0xe4   : > { %v1982_v34 = vpop.permute.xlu0 %1053 }
 0x10a   : > { %v1431_v32 = vpop.f32.mrf.mxu0  ;;  %v1449_v43 = vpop.f32.mrf.mxu1 }
 0x10c   : > { %v1432_v44 = vpop.f32.mrf.mxu0  ;;  %v1450_v45 = vpop.f32.mrf.mxu1 }
 0x10d   : > { %v1433_v48 = vadd.f32 %v1432_v44, %v1431_v32  ;;  %v1451_v22 = vadd.f32 %v1450_v45, %v1449_v43  ;;  %v1106_v44 = vpop.permute.xlu1 %1105 }
 0x10e   : > { %v1434_v46 = vpop.f32.mrf.mxu0  ;;  %v1452_v47 = vpop.f32.mrf.mxu1  ;;  %vm1128_vm11 = vcmp.eq.s32.totalorder %v1106_v44, 1 }
 0x10f   : > { %v559_v58 = vadd.f32 %v1433_v48, %v1387_v51  ;;  %v589_v28 = vadd.f32 %v1451_v22, %v1387_v51 }
 0x110   : > { %v1435_v49 = vpop.f32.mrf.mxu0  ;;  %v1453_v50 = vpop.f32.mrf.mxu1 }
 0x111   : > { %v1436_v52 = vadd.f32 %v1435_v49, %v1434_v46  ;;  %v1168_v53 = vpop.xlane.xlu0 %1167  ;;  %v1454_v31 = vadd.f32 %v1453_v50, %v1452_v47  ;;  %v1109_v45 = vpop.permute.xlu1 %1108 }
 0x112   : > { %v1437_v54 = vpop.f32.mrf.mxu0  ;;  %v1471_v55 = vpop.f32.mrf.mxu1  ;;  %v1169_v56 = vrot.slane %v1168_v53, 4  ;;  %vm1129_vm12 = vcmp.eq.s32.totalorder %v1109_v45, 1 }
 0x113   : > { %v564_v57 = vadd.f32 %v1436_v52, %v1387_v51  ;;  %v594_v32 = vadd.f32 %v1454_v31, %v1387_v51 }
 0x114   : > { %v1438_v59 = vpop.f32.mrf.mxu0  ;;  %v663_v60 = vpop.f32.mrf.mxu1  ;;  %v1170_v61 = vadd.f32 %v1169_v56, %v1168_v53 }
 0x115   : > { %v669_v62 = vadd.f32 %v1471_v55, %v564_v57  ;;  %v1439_v63 = vadd.f32 %v1438_v59, %v1437_v54  ;;  %v664_v1 = vadd.f32 %v663_v60, %v559_v58  ;;  %v1112_v46 = vpop.permute.xlu1 %1111 }
 0x116   : > { %v1440_v2 = vpop.f32.mrf.mxu0  ;;  %v1474_v3 = vpop.f32.mrf.mxu1  ;;  %v1171_v4 = vrot.slane %v1170_v61, 2  ;;  %vm1130_vm13 = vcmp.eq.s32.totalorder %v1112_v46, 1 }
 0x117   : > { %734 = vxpose.xlu0.b32.start.end [1/1] (short) (narrow) %v669_v62, 8  ;;  %702 = vxpose.xlu1.b32.start.end [1/1] (short) (narrow) %v664_v1, 8  ;;  %v569_v5 = vadd.f32 %v1439_v63, %v1387_v51 }
 0x118   : > { %v1441_v6 = vpop.f32.mrf.mxu0  ;;  %v673_v7 = vpop.f32.mrf.mxu1  ;;  %v1172_v8 = vadd.f32 %v1171_v4, %v1170_v61 }
 0x119   : > { %v1442_v9 = vadd.f32 %v1441_v6, %v1440_v2  ;;  %v674_v10 = vadd.f32 %v673_v7, %v569_v5  ;;  %v1115_v47 = vpop.permute.xlu1 %1114 }
 0x11a   : > { %v1443_v11 = vpop.f32.mrf.mxu0  ;;  %v1477_v12 = vpop.f32.mrf.mxu1  ;;  %v1173_v13 = vrot.slane %v1172_v8, 1  ;;  %vm1131_vm14 = vcmp.eq.s32.totalorder %v1115_v47, 1 }
 0x11b   : > { %v574_v14 = vadd.f32 %v1442_v9, %v1387_v51  ;;  %766 = vxpose.xlu1.b32.start.end [1/1] (short) (narrow) %v674_v10, 8 }
 0x11c   : > { %v1444_v15 = vpop.f32.mrf.mxu0  ;;  %v683_v16 = vpop.f32.mrf.mxu1  ;;  %v1174_v17 = vadd.f32 %v1173_v13, %v1172_v8 }
 0x11d   : > { %v1445_v18 = vadd.f32 %v1444_v15, %v1443_v11  ;;  %v679_v19 = vadd.f32 %v1474_v3, %v574_v14  ;;  %v1118_v48 = vpop.permute.xlu1 %1117 }
 0x11e   : > { %v1446_v20 = vpop.f32.mrf.mxu0  ;;  %v1480_v21 = vpop.f32.mrf.mxu1  ;;  %1516 = vpush %v1174_v17  ;;  %vm1132_vm15 = vcmp.eq.s32.totalorder %v1118_v48, 1 }
 0x11f   : > { %v579_v23 = vadd.f32 %v1445_v18, %v1387_v51  ;;  %798 = vxpose.xlu1.b32.start.end [1/1] (short) (narrow) %v679_v19, 8  ;;  %v699_v43 = vadd.f32 %v1480_v21, %v594_v32  ;;  %v975_v19 = vld [vmem:[%s1993_s22] sm:$0xf] }
 0x120   : > { %v1447_v24 = vpop.f32.mrf.mxu0  ;;  %v693_v27 = vpop.f32.mrf.mxu1 }
 0x121   : > { %v684_v25 = vadd.f32 %v683_v16, %v579_v23  ;;  %v1448_v26 = vadd.f32 %v1447_v24, %v1446_v20  ;;  %v694_v30 = vadd.f32 %v693_v27, %v589_v28  ;;  %v1121_v49 = vpop.permute.xlu1 %1120 }
 0x122   : > { %vm1133_vm0 = vcmp.eq.s32.totalorder %v1121_v49, 1 }
 0x123   : > { %830 = vxpose.xlu1.b32.start.end [1/1] (short) (narrow) %v684_v25, 8  ;;  %v584_v29 = vadd.f32 %v1448_v26, %v1387_v51 }
 0x125   : > { %v689_v33 = vadd.f32 %v1477_v12, %v584_v29  ;;  %v1124_v50 = vpop.permute.xlu1 %1123 }
 0x126   : > { %vm1134_vm1 = vcmp.eq.s32.totalorder %v1124_v50, 1 }
 0x127   : > { %894 = vxpose.xlu1.b32.start.end [1/1] (short) (narrow) %v694_v30, 8 }
 0x129   : > { %v1127_v52 = vpop.permute.xlu1 %1126 }
 0x12a   : > { %vm1135_vm2 = vcmp.eq.s32.totalorder %v1127_v52, 1 }
 0x12b   : > { %862 = vxpose.xlu1.b32.start.end [1/1] (short) (narrow) %v689_v33, 8 }
 0x12f   : > { %926 = vxpose.xlu1.b32.start.end [1/1] (short) (narrow) %v699_v43, 8 }
 0x14f   : > { %s1517_s9 = spop %1516 }
 0x150   : > { %s1189_s10 = smul.f32 4.0, %s1517_s9 }
 0x152   : > { %v1190_v26 = vstv %s1189_s10 }
 0x153   : > { %1579 = vrcp.f32 %v1190_v26 }
 0x160   : > { %v1580_v27 = vpop.eup %1579 }
 0x193   : > { %v750_v51 = vpop.trf.xlu0  ;;  %v718_v53 = vpop.trf.xlu1 }
 0x194   : > { %960 = vst.msk [vmem:[%s2001_s24 + $0x4] sm:$0xf] %vm400_vm10, %v750_v51  ;;  %959 = vst.msk [vmem:[%s2001_s24] sm:$0xf] %vm400_vm10, %v718_v53  ;;  %v1057_v55 = vmul.f32 %v1970_v38, %v750_v51  ;;  %v1056_v56 = vmul.f32 %v1968_v37, %v718_v53 }
 0x196   : > { %v1137_v59 = vsel %vm1129_vm12, %v1057_v55, 0.0  ;;  %v1136_v60 = vsel %vm1128_vm11, %v1056_v56, 0.0 }
 0x197   : > { %v782_v54 = vpop.trf.xlu1  ;;  %v1145_v37 = vsel %vm400_vm10, %v1137_v59, 0.0 }
 0x198   : > { %961 = vst.msk [vmem:[%s2001_s24 + $0x8] sm:$0xf] %vm400_vm10, %v782_v54  ;;  %v1058_v58 = vmul.f32 %v1972_v39, %v782_v54  ;;  %v1144_v39 = vsel %vm400_vm10, %v1136_v60, 0.0 }
 0x199   : > { %v1146_v4 = vadd.f32 %v1145_v37, %v1144_v39 }
 0x19a   : > { %v1138_v63 = vsel %vm1130_vm13, %v1058_v58, 0.0 }
 0x19b   : > { %v814_v57 = vpop.trf.xlu1  ;;  %v1147_v2 = vsel %vm400_vm10, %v1138_v63, 0.0 }
 0x19c   : > { %962 = vst.msk [vmem:[%s2001_s24 + $0xc] sm:$0xf] %vm400_vm10, %v814_v57  ;;  %v1059_v61 = vmul.f32 %v1974_v40, %v814_v57  ;;  %v1148_v6 = vadd.f32 %v1147_v2, %v1146_v4 }
 0x19e   : > { %v1139_v1 = vsel %vm1131_vm14, %v1059_v61, 0.0 }
 0x19f   : > { %v846_v62 = vpop.trf.xlu1  ;;  %v1149_v5 = vsel %vm400_vm10, %v1139_v1, 0.0 }
 0x1a0   : > { %963 = vst.msk [vmem:[%s2001_s24 + $0x10] sm:$0xf] %vm400_vm10, %v846_v62  ;;  %v1060_v38 = vmul.f32 %v1976_v41, %v846_v62  ;;  %v1150_v9 = vadd.f32 %v1149_v5, %v1148_v6 }
 0x1a2   : > { %v1140_v40 = vsel %vm1132_vm15, %v1060_v38, 0.0 }
 0x1a3   : > { %v910_v3 = vpop.trf.xlu1  ;;  %v1151_v7 = vsel %vm400_vm10, %v1140_v40, 0.0 }
 0x1a4   : > { %965 = vst.msk [vmem:[%s2001_s24 + $0x18] sm:$0xf] %vm400_vm10, %v910_v3  ;;  %v1062_v41 = vmul.f32 %v1980_v42, %v910_v3  ;;  %v1152_v11 = vadd.f32 %v1151_v7, %v1150_v9 }
 0x1a6   : > { %v1142_v12 = vsel %vm1134_vm1, %v1062_v41, 0.0 }
 0x1a7   : > { %v878_v8 = vpop.trf.xlu1  ;;  %v1155_v17 = vsel %vm400_vm10, %v1142_v12, 0.0 }
 0x1a8   : > { %964 = vst.msk [vmem:[%s2001_s24 + $0x14] sm:$0xf] %vm400_vm10, %v878_v8  ;;  %v1061_v10 = vmul.f32 %v1978_v0, %v878_v8 }
 0x1aa   : > { %v1141_v13 = vsel %vm1133_vm0, %v1061_v10, 0.0 }
 0x1ab   : > { %v1153_v14 = vsel %vm400_vm10, %v1141_v13, 0.0  ;;  %v942_v15 = vpop.trf.xlu1 }
 0x1ac   : > { %v1154_v42 = vadd.f32 %v1153_v14, %v1152_v11  ;;  %966 = vst.msk [vmem:[%s2001_s24 + $0x1c] sm:$0xf] %vm400_vm10, %v942_v15  ;;  %v1063_v16 = vmul.f32 %v1982_v34, %v942_v15 }
 0x1ae   : > { %v1156_v0 = vadd.f32 %v1155_v17, %v1154_v42  ;;  %v1143_v18 = vsel %vm1135_vm2, %v1063_v16, 0.0 }
 0x1af   : > { %v1157_v20 = vsel %vm400_vm10, %v1143_v18, 0.0 }
 0x1b0   : > { %v1158_v21 = vadd.f32 %v1157_v20, %v1156_v0 }
 0x1b2   : > { %v1159_v22 = vadd.f32 %v1158_v21, %v975_v19 }
 0x1b4   : > { %1160 = vst.msk [vmem:[%s1993_s22] sm:$0xf] %vm400_vm10, %v1159_v22 }
 0x1bb   : > { %v1176_v23 = vld [vmem:[%s1993_s22] sm:$0xf] }
 0x1bc   : > { %v1183_v24 = vmul.f32 %v1892_v36, %v1176_v23 }
 0x1be   : > { %v1185_v25 = vmul.f32 %v1183_v24, %v1892_v36  ;;  %1184 = vst.msk [vmem:[%s1993_s22] sm:$0xf] %vm400_vm10, %v1183_v24 }
 0x1c0   : > { %v1186_v34 = vsel %vm400_vm10, %v1185_v25, 0.0 }
 0x1c1   : > { %1187 = vadd.xlane.f32.xlu1 %v1186_v34 }
 0x24a   : > { %v1188_v28 = vpop.xlane.xlu1 %1187 }
 0x24b   : > { %v1192_v29 = vmul.f32 %v1580_v27, %v1188_v28 }
 0x24d   : > { %1194 = vst.msk [vmem:[%s395_s15] sm:$0xf] %vm1193_vm3, %v1192_v29 }
 0x24e PF: > { %s21_s29 = sadd.s32 1, %s1659_s29   ;;  %s2077_s24 = smov %s1643_s25 }
 0x24f   : > { %p18_p8 = scmp.ge.s32.totalorder %s21_s29, 4   ;;  %s2078_s25 = smov %s1647_s26 }
 0x250   : > { %s2079_s26 = smov %s1751_s12  ;;  %s2080_s27 = smov %s1655_s28 }
 0x251   : > { %s2081_s28 = smov %s2083_s8  ;;  %20 = sbr.rel (!%p18_p8) target bundleno = 4 (0x4), region = 118 }
 0x256   :  { %1253 = vsyncpa [#allocation3], 1 }
 0x257   :  { %1255 = vsyncpa [#allocation3 + $0x1], 1 }

</bundles_post_ra>
